<compile_context>
chip_gen: v5e
topology: v5e:2x2
jax: 0.10.0
libtpu: 0.0.40
codegen_flags: <defaults>
</compile_context>

<pallas_src>
import math

import jax
import jax.numpy as jnp
from jax.experimental import pallas as pl
from jax.experimental.pallas import tpu as pltpu

# ------------------------- hyper-parameters (small) -------------------------
B = 2          # batch
S_LEN = 8      # source sequence length
T_LEN = 8      # target sequence length
EMB = 32       # embedding dim
HID = 32       # conv hidden dim
KSZ = 3        # conv kernel size (odd)
NLAYERS = 2    # conv layers in encoder and decoder
IN_VOCAB = 48
OUT_VOCAB = 48
MAX_LEN = 16
SCALE = math.sqrt(0.5)
F32 = jnp.float32

VOCAB_PAD = ((OUT_VOCAB + 127) // 128) * 128   # lane-dense logits (48 -> 128)
ATTN_PAD = ((S_LEN + 127) // 128) * 128        # lane-dense attention (8 -> 128)


def _linear(x, w_ref, b_ref):
    return jnp.dot(x, w_ref[...], preferred_element_type=F32) + b_ref[...]


# ========================= fused encoder+decoder ============================
def seq2seq_kernel(semb_ref, temb_ref,
                   ewe2h_ref, ebe2h_ref, ecw_ref, ecb_ref, ewh2e_ref, ebh2e_ref,
                   dwe2h_ref, dbe2h_ref, dcw_ref, dcb_ref,
                   dwah2e_ref, dbah2e_ref, dwae2h_ref, dbae2h_ref,
                   dwh2e_ref, dbh2e_ref, dwout_ref, dbout_ref,
                   out_ref, attn_ref):
    S, E = semb_ref.shape
    T = temb_ref.shape[0]
    H = ewe2h_ref.shape[1]
    L = ecw_ref.shape[0]
    K = KSZ

    def shifted(x, d, rows):
        # Row-shifted copy of x with zero fill (in registers, no VMEM scratch).
        if d == 0:
            return x
        if d < 0:
            return jnp.concatenate(
                [jnp.zeros((-d, H), F32), x[:rows + d, :]], axis=0)
        return jnp.concatenate(
            [x[d:, :], jnp.zeros((d, H), F32)], axis=0)

    def conv_glu(x, rows, left_pad, w, b):
        # im2col [rows, K*H] -> single matmul against packed [K*H, 2H] weight.
        taps = [shifted(x, t - left_pad, rows) for t in range(K)]
        im2col = jnp.concatenate(taps, axis=1)                     # [rows, K*H]
        ag = jnp.dot(im2col, w, preferred_element_type=F32) + b    # [rows, 2H]
        return ag[:, :H] * jax.nn.sigmoid(ag[:, H:])               # GLU

    # ------------------------------ encoder ---------------------------------
    src_emb = semb_ref[...]                                        # [S, E]
    x = _linear(src_emb, ewe2h_ref, ebe2h_ref)                     # [S, H]
    pad = (K - 1) // 2
    for l in range(L):
        glu = conv_glu(x, S, pad, ecw_ref[l], ecb_ref[l])
        x = (glu + x) * SCALE
    enc_conved = _linear(x, ewh2e_ref, ebh2e_ref)                  # [S, E]
    enc_combined = (enc_conved + src_emb) * SCALE                  # [S, E]

    # ------------------------------ decoder ---------------------------------
    trg_emb = temb_ref[...]                                        # [T, E]
    y = _linear(trg_emb, dwe2h_ref, dbe2h_ref)                     # [T, H]
    attn = jnp.zeros((T, S), F32)
    for l in range(L):
        glu = conv_glu(y, T, K - 1, dcw_ref[l], dcb_ref[l])        # causal pad

        # ------------------------ attention ------------------------
        conved_emb = _linear(glu, dwah2e_ref, dbah2e_ref)          # [T, E]
        comb = (conved_emb + trg_emb) * SCALE
        energy = jax.lax.dot_general(                              # [T, S]
            comb, enc_conved, (((1,), (1,)), ((), ())),
            preferred_element_type=F32)
        energy = energy - jnp.max(energy, axis=-1, keepdims=True)
        p = jnp.exp(energy)
        attn = p / jnp.sum(p, axis=-1, keepdims=True)              # softmax
        attended = jnp.dot(attn, enc_combined, preferred_element_type=F32)
        attended = _linear(attended, dwae2h_ref, dbae2h_ref)       # [T, H]
        glu = (glu + attended) * SCALE
        y = (glu + y) * SCALE

    conved = _linear(y, dwh2e_ref, dbh2e_ref)                      # [T, E]
    out_ref[...] = _linear(conved, dwout_ref, dbout_ref)           # [T, VPAD]

    if attn_ref.shape[1] > S:                                      # lane-dense
        attn = jnp.concatenate(
            [attn, jnp.zeros((T, attn_ref.shape[1] - S), F32)], axis=1)
    attn_ref[...] = attn


# ============================= JAX-side glue ================================
def _embed(tok_table, pos_table, tokens):
    # TODO(synk): embedding gather has no clean Pallas tile equivalent at this
    # size; done in plain JAX.
    T = tokens.shape[1]
    pos = jnp.arange(T)
    return (tok_table[tokens] + pos_table[pos][None, :, :]).astype(F32)


def _wspec(shape):
    return pl.BlockSpec(shape, lambda b, _s=shape: (0,) * len(_s))


def _pack_conv_weights(cwa, cwg):
    # [L, K, H, H] x2 -> [L, K*H, 2H]; rows ordered tap-major to match im2col.
    L, K, H, _ = cwa.shape
    w = jnp.concatenate([cwa, cwg], axis=-1)          # [L, K, H, 2H]
    return w.reshape(L, K * H, 2 * H)


def _pack_conv_bias(cba, cbg):
    # [L, 1, H] x2 -> [L, 1, 2H]
    return jnp.concatenate([cba, cbg], axis=-1)


def seq2seq_forward(params, src_input, trg_input, trg_output):
    # Mirrors Seq2Seq.forward(src_input, trg_input, trg_output).
    del trg_output  # unused in the forward pass (only used by the loss outside)

    src_emb = _embed(params["enc_tok"], params["enc_pos"], src_input)  # [B,S,E]
    trg_emb = _embed(params["dec_tok"], params["dec_pos"], trg_input)  # [B,T,E]
    Bn, S, E = src_emb.shape
    T = trg_emb.shape[1]
    H, K, L = HID, KSZ, NLAYERS
    VP, AP = VOCAB_PAD, ATTN_PAD

    ecw = _pack_conv_weights(params["enc_cwa"], params["enc_cwg"])
    ecb = _pack_conv_bias(params["enc_cba"], params["enc_cbg"])
    dcw = _pack_conv_weights(params["dec_cwa"], params["dec_cwg"])
    dcb = _pack_conv_bias(params["dec_cba"], params["dec_cbg"])

    # Lane-dense output head: zero-pad vocab dim to a multiple of 128.
    wout_p = jnp.zeros((E, VP), F32).at[:, :OUT_VOCAB].set(params["dec_wout"])
    bout_p = jnp.zeros((1, VP), F32).at[:, :OUT_VOCAB].set(params["dec_bout"])

    args = (src_emb, trg_emb,
            params["enc_we2h"], params["enc_be2h"], ecw, ecb,
            params["enc_wh2e"], params["enc_bh2e"],
            params["dec_we2h"], params["dec_be2h"], dcw, dcb,
            params["dec_wah2e"], params["dec_bah2e"],
            params["dec_wae2h"], params["dec_bae2h"],
            params["dec_wh2e"], params["dec_bh2e"], wout_p, bout_p)

    in_specs = [
        pl.BlockSpec((None, S, E), lambda b: (b, 0, 0)),
        pl.BlockSpec((None, T, E), lambda b: (b, 0, 0)),
        _wspec((E, H)), _wspec((1, H)),
        _wspec((L, K * H, 2 * H)), _wspec((L, 1, 2 * H)),
        _wspec((H, E)), _wspec((1, E)),
        _wspec((E, H)), _wspec((1, H)),
        _wspec((L, K * H, 2 * H)), _wspec((L, 1, 2 * H)),
        _wspec((H, E)), _wspec((1, E)),
        _wspec((E, H)), _wspec((1, H)),
        _wspec((H, E)), _wspec((1, E)),
        _wspec((E, VP)), _wspec((1, VP)),
    ]
    out_specs = (pl.BlockSpec((None, T, VP), lambda b: (b, 0, 0)),
                 pl.BlockSpec((None, T, AP), lambda b: (b, 0, 0)))
    out_shape = (jax.ShapeDtypeStruct((Bn, T, VP), F32),
                 jax.ShapeDtypeStruct((Bn, T, AP), F32))

    # Advisory cost estimate (rough, per full call).
    enc_flops = 2 * S * E * H + L * 2 * S * (K * H) * (2 * H) + 2 * S * H * E
    dec_flops = (2 * T * E * H
                 + L * (2 * T * (K * H) * (2 * H) + 2 * T * H * E
                        + 2 * T * E * S + 2 * T * S * E + 2 * T * E * H)
                 + 2 * T * H * E + 2 * T * E * VP)
    cost = pl.CostEstimate(
        flops=Bn * (enc_flops + dec_flops),
        transcendentals=Bn * L * (S * H + T * H + T * S),
        bytes_accessed=4 * (sum(int(a.size) for a in args)
                            + Bn * T * (VP + AP)),
    )

    out_p, attn_p = pl.pallas_call(
        seq2seq_kernel, out_shape=out_shape, grid=(Bn,),
        in_specs=in_specs, out_specs=out_specs,
        compiler_params=pltpu.CompilerParams(
            dimension_semantics=("parallel",)),   # v7x: one batch elem per TC
        cost_estimate=cost,
    )(*args)

    return out_p[:, :, :OUT_VOCAB], attn_p[:, :, :S]


# ======================= deterministic param init ==========================
def init_params(key):
    keys = iter(jax.random.split(key, 32))

    def w(shape):
        return jax.random.normal(next(keys), shape, F32) * 0.1

    H, E, K, L = HID, EMB, KSZ, NLAYERS
    return {
        # encoder
        "enc_tok": w((IN_VOCAB, E)), "enc_pos": w((MAX_LEN, E)),
        "enc_we2h": w((E, H)), "enc_be2h": w((1, H)),
        "enc_cwa": w((L, K, H, H)), "enc_cwg": w((L, K, H, H)),
        "enc_cba": w((L, 1, H)), "enc_cbg": w((L, 1, H)),
        "enc_wh2e": w((H, E)), "enc_bh2e": w((1, E)),
        # decoder
        "dec_tok": w((OUT_VOCAB, E)), "dec_pos": w((MAX_LEN, E)),
        "dec_we2h": w((E, H)), "dec_be2h": w((1, H)),
        "dec_cwa": w((L, K, H, H)), "dec_cwg": w((L, K, H, H)),
        "dec_cba": w((L, 1, H)), "dec_cbg": w((L, 1, H)),
        "dec_wah2e": w((H, E)), "dec_bah2e": w((1, E)),
        "dec_wae2h": w((E, H)), "dec_bae2h": w((1, H)),
        "dec_wh2e": w((H, E)), "dec_bh2e": w((1, E)),
        "dec_wout": w((E, OUT_VOCAB)), "dec_bout": w((1, OUT_VOCAB)),
    }


# ========================= pure-JAX reference ==============================
def _ref_conv_glu(x, cwa, cwg, cba, cbg, left_pad, right_pad):
    Bn, Sn, H = x.shape
    K = cwa.shape[0]
    xp = jnp.pad(x, ((0, 0), (left_pad, right_pad), (0, 0)))
    acc_a = jnp.zeros((Bn, Sn, H), F32)
    acc_g = jnp.zeros((Bn, Sn, H), F32)
    for t in range(K):
        acc_a += jnp.einsum("bsh,ho->bso", xp[:, t:t + Sn, :], cwa[t])
        acc_g += jnp.einsum("bsh,ho->bso", xp[:, t:t + Sn, :], cwg[t])
    return (acc_a + cba) * jax.nn.sigmoid(acc_g + cbg)


def ref_seq2seq(p, src, trg):
    src_emb = _embed(p["enc_tok"], p["enc_pos"], src)
    x = src_emb @ p["enc_we2h"] + p["enc_be2h"]
    pad = (KSZ - 1) // 2
    for l in range(NLAYERS):
        glu = _ref_conv_glu(x, p["enc_cwa"][l], p["enc_cwg"][l],
                            p["enc_cba"][l], p["enc_cbg"][l], pad, pad)
        x = (glu + x) * SCALE
    enc_conved = x @ p["enc_wh2e"] + p["enc_bh2e"]
    enc_combined = (enc_conved + src_emb) * SCALE

    trg_emb = _embed(p["dec_tok"], p["dec_pos"], trg)
    y = trg_emb @ p["dec_we2h"] + p["dec_be2h"]
    attn = None
    for l in range(NLAYERS):
        glu = _ref_conv_glu(y, p["dec_cwa"][l], p["dec_cwg"][l],
                            p["dec_cba"][l], p["dec_cbg"][l], KSZ - 1, 0)
        conved_emb = glu @ p["dec_wah2e"] + p["dec_bah2e"]
        comb = (conved_emb + trg_emb) * SCALE
        energy = jnp.einsum("bte,bse->bts", comb, enc_conved)
        energy = energy - jnp.max(energy, axis=-1, keepdims=True)
        pr = jnp.exp(energy)
        attn = pr / jnp.sum(pr, axis=-1, keepdims=True)
        attended = jnp.einsum("bts,bse->bte", attn, enc_combined)
        attended = attended @ p["dec_wae2h"] + p["dec_bae2h"]
        glu = (glu + attended) * SCALE
        y = (glu + y) * SCALE
    conved = y @ p["dec_wh2e"] + p["dec_bh2e"]
    out = conved @ p["dec_wout"] + p["dec_bout"]
    return out, attn


# ================================== main ====================================
if __name__ == "__main__":
    root = jax.random.PRNGKey(0)
    pkey, skey, tkey, okey = jax.random.split(root, 4)
    params = init_params(pkey)

    src_input = jax.random.randint(skey, (B, S_LEN), 0, IN_VOCAB, dtype=jnp.int32)
    trg_input = jax.random.randint(tkey, (B, T_LEN), 0, OUT_VOCAB, dtype=jnp.int32)
    trg_output = jax.random.randint(okey, (B, T_LEN), 0, OUT_VOCAB, dtype=jnp.int32)

    fwd = jax.jit(seq2seq_forward)
    output, attention = fwd(params, src_input, trg_input, trg_output)
    jax.block_until_ready((output, attention))

    ref_out, ref_attn = ref_seq2seq(params, src_input, trg_input)
    assert output.shape == (B, T_LEN, OUT_VOCAB)
    assert attention.shape == (B, T_LEN, S_LEN)
    assert jnp.allclose(output, ref_out, atol=1e-4, rtol=1e-4)
    assert jnp.allclose(attention, ref_attn, atol=1e-4, rtol=1e-4)

    print("KERNEL_OK")
</pallas_src>

<mosaic_0001>
module attributes {stable_mosaic.version = 11 : i64} {
  func.func @seq2seq_kernel(%arg0: i32, %arg1: memref<1x8x32xf32, #tpu.memory_space<vmem>>, %arg2: memref<1x8x32xf32, #tpu.memory_space<vmem>>, %arg3: memref<32x32xf32, #tpu.memory_space<vmem>>, %arg4: memref<1x32xf32, #tpu.memory_space<vmem>>, %arg5: memref<2x96x64xf32, #tpu.memory_space<vmem>>, %arg6: memref<2x1x64xf32, #tpu.memory_space<vmem>>, %arg7: memref<32x32xf32, #tpu.memory_space<vmem>>, %arg8: memref<1x32xf32, #tpu.memory_space<vmem>>, %arg9: memref<32x32xf32, #tpu.memory_space<vmem>>, %arg10: memref<1x32xf32, #tpu.memory_space<vmem>>, %arg11: memref<2x96x64xf32, #tpu.memory_space<vmem>>, %arg12: memref<2x1x64xf32, #tpu.memory_space<vmem>>, %arg13: memref<32x32xf32, #tpu.memory_space<vmem>>, %arg14: memref<1x32xf32, #tpu.memory_space<vmem>>, %arg15: memref<32x32xf32, #tpu.memory_space<vmem>>, %arg16: memref<1x32xf32, #tpu.memory_space<vmem>>, %arg17: memref<32x32xf32, #tpu.memory_space<vmem>>, %arg18: memref<1x32xf32, #tpu.memory_space<vmem>>, %arg19: memref<32x128xf32, #tpu.memory_space<vmem>>, %arg20: memref<1x128xf32, #tpu.memory_space<vmem>>, %arg21: memref<1x8x128xf32, #tpu.memory_space<vmem>>, %arg22: memref<1x8x128xf32, #tpu.memory_space<vmem>>) attributes {dimension_semantics = [#tpu.dimension_semantics<parallel>], iteration_bounds = array<i64: 2>, scalar_prefetch = 0 : i64, scratch_operands = 0 : i64, tpu.core_type = #tpu.core_type<tc>, window_params = [{transform_indices = @transform_0, window_bounds = array<i64: 1, 8, 32>}, {transform_indices = @transform_1, window_bounds = array<i64: 1, 8, 32>}, {pipeline_mode = #tpu.pipeline_mode<synchronous>, transform_indices = @transform_2, window_bounds = array<i64: 32, 32>}, {pipeline_mode = #tpu.pipeline_mode<synchronous>, transform_indices = @transform_3, window_bounds = array<i64: 1, 32>}, {pipeline_mode = #tpu.pipeline_mode<synchronous>, transform_indices = @transform_4, window_bounds = array<i64: 2, 96, 64>}, {pipeline_mode = #tpu.pipeline_mode<synchronous>, transform_indices = @transform_5, window_bounds = array<i64: 2, 1, 64>}, {pipeline_mode = #tpu.pipeline_mode<synchronous>, transform_indices = @transform_6, window_bounds = array<i64: 32, 32>}, {pipeline_mode = #tpu.pipeline_mode<synchronous>, transform_indices = @transform_7, window_bounds = array<i64: 1, 32>}, {pipeline_mode = #tpu.pipeline_mode<synchronous>, transform_indices = @transform_8, window_bounds = array<i64: 32, 32>}, {pipeline_mode = #tpu.pipeline_mode<synchronous>, transform_indices = @transform_9, window_bounds = array<i64: 1, 32>}, {pipeline_mode = #tpu.pipeline_mode<synchronous>, transform_indices = @transform_10, window_bounds = array<i64: 2, 96, 64>}, {pipeline_mode = #tpu.pipeline_mode<synchronous>, transform_indices = @transform_11, window_bounds = array<i64: 2, 1, 64>}, {pipeline_mode = #tpu.pipeline_mode<synchronous>, transform_indices = @transform_12, window_bounds = array<i64: 32, 32>}, {pipeline_mode = #tpu.pipeline_mode<synchronous>, transform_indices = @transform_13, window_bounds = array<i64: 1, 32>}, {pipeline_mode = #tpu.pipeline_mode<synchronous>, transform_indices = @transform_14, window_bounds = array<i64: 32, 32>}, {pipeline_mode = #tpu.pipeline_mode<synchronous>, transform_indices = @transform_15, window_bounds = array<i64: 1, 32>}, {pipeline_mode = #tpu.pipeline_mode<synchronous>, transform_indices = @transform_16, window_bounds = array<i64: 32, 32>}, {pipeline_mode = #tpu.pipeline_mode<synchronous>, transform_indices = @transform_17, window_bounds = array<i64: 1, 32>}, {pipeline_mode = #tpu.pipeline_mode<synchronous>, transform_indices = @transform_18, window_bounds = array<i64: 32, 128>}, {pipeline_mode = #tpu.pipeline_mode<synchronous>, transform_indices = @transform_19, window_bounds = array<i64: 1, 128>}, {transform_indices = @transform_20, window_bounds = array<i64: 1, 8, 128>}, {transform_indices = @transform_21, window_bounds = array<i64: 1, 8, 128>}]} {
    %c0 = arith.constant 0 : index
    %c0_0 = arith.constant 0 : index
    %c0_1 = arith.constant 0 : index
    %0 = vector.load %arg1[%c0, %c0_0, %c0_1] : memref<1x8x32xf32, #tpu.memory_space<vmem>>, vector<1x8x32xf32>
    %1 = vector.shape_cast %0 : vector<1x8x32xf32> to vector<8x32xf32>
    %c0_2 = arith.constant 0 : index
    %c0_3 = arith.constant 0 : index
    %2 = vector.load %arg3[%c0_2, %c0_3] : memref<32x32xf32, #tpu.memory_space<vmem>>, vector<32x32xf32>
    %cst = arith.constant dense<0.000000e+00> : vector<8x32xf32>
    %3 = tpu.matmul %1, %2, %cst {dimension_numbers = #tpu.dot_dimension_numbers<[1], [0], [0], [1], [0, 0, 1, 1], [], []>} : vector<8x32xf32>, vector<32x32xf32>, vector<8x32xf32> -> vector<8x32xf32>
    %c0_4 = arith.constant 0 : index
    %c0_5 = arith.constant 0 : index
    %4 = vector.load %arg4[%c0_4, %c0_5] : memref<1x32xf32, #tpu.memory_space<vmem>>, vector<1x32xf32>
    %5 = vector.broadcast %4 : vector<1x32xf32> to vector<8x32xf32>
    %6 = arith.addf %3, %5 : vector<8x32xf32>
    %c0_6 = arith.constant 0 : index
    %c0_7 = arith.constant 0 : index
    %c0_8 = arith.constant 0 : index
    %7 = vector.load %arg5[%c0_6, %c0_7, %c0_8] : memref<2x96x64xf32, #tpu.memory_space<vmem>>, vector<1x96x64xf32>
    %8 = vector.shape_cast %7 : vector<1x96x64xf32> to vector<96x64xf32>
    %c0_9 = arith.constant 0 : index
    %c0_10 = arith.constant 0 : index
    %c0_11 = arith.constant 0 : index
    %9 = vector.load %arg6[%c0_9, %c0_10, %c0_11] : memref<2x1x64xf32, #tpu.memory_space<vmem>>, vector<1x1x64xf32>
    %10 = vector.shape_cast %9 : vector<1x1x64xf32> to vector<1x64xf32>
    %cst_12 = arith.constant 0.000000e+00 : f32
    %11 = vector.broadcast %cst_12 : f32 to vector<1x32xf32>
    %12 = vector.extract_strided_slice %6 {offsets = [0, 0], sizes = [7, 32], strides = [1, 1]} : vector<8x32xf32> to vector<7x32xf32>
    %13 = tpu.concatenate %11, %12 in 0 : vector<1x32xf32>, vector<7x32xf32> -> vector<8x32xf32>
    %14 = vector.extract_strided_slice %6 {offsets = [1, 0], sizes = [7, 32], strides = [1, 1]} : vector<8x32xf32> to vector<7x32xf32>
    %cst_13 = arith.constant 0.000000e+00 : f32
    %15 = vector.broadcast %cst_13 : f32 to vector<1x32xf32>
    %16 = tpu.concatenate %14, %15 in 0 : vector<7x32xf32>, vector<1x32xf32> -> vector<8x32xf32>
    %17 = tpu.concatenate %13, %6, %16 in 1 : vector<8x32xf32>, vector<8x32xf32>, vector<8x32xf32> -> vector<8x96xf32>
    %cst_14 = arith.constant dense<0.000000e+00> : vector<8x64xf32>
    %18 = tpu.matmul %17, %8, %cst_14 {dimension_numbers = #tpu.dot_dimension_numbers<[1], [0], [0], [1], [0, 0, 1, 1], [], []>} : vector<8x96xf32>, vector<96x64xf32>, vector<8x64xf32> -> vector<8x64xf32>
    %19 = vector.broadcast %10 : vector<1x64xf32> to vector<8x64xf32>
    %20 = arith.addf %18, %19 : vector<8x64xf32>
    %21 = vector.extract_strided_slice %20 {offsets = [0, 0], sizes = [8, 32], strides = [1, 1]} : vector<8x64xf32> to vector<8x32xf32>
    %22 = vector.extract_strided_slice %20 {offsets = [0, 32], sizes = [8, 32], strides = [1, 1]} : vector<8x64xf32> to vector<8x32xf32>
    %23 = arith.negf %22 : vector<8x32xf32>
    %24 = math.exp %23 : vector<8x32xf32>
    %cst_15 = arith.constant 1.000000e+00 : f32
    %25 = vector.broadcast %cst_15 : f32 to vector<8x32xf32>
    %26 = arith.addf %25, %24 : vector<8x32xf32>
    %27 = arith.divf %25, %26 : vector<8x32xf32>
    %28 = arith.mulf %21, %27 : vector<8x32xf32>
    %29 = arith.addf %28, %6 : vector<8x32xf32>
    %cst_16 = arith.constant 0.707106769 : f32
    %30 = vector.broadcast %cst_16 : f32 to vector<8x32xf32>
    %31 = arith.mulf %29, %30 : vector<8x32xf32>
    %c1 = arith.constant 1 : index
    %c0_17 = arith.constant 0 : index
    %c0_18 = arith.constant 0 : index
    %32 = vector.load %arg5[%c1, %c0_17, %c0_18] : memref<2x96x64xf32, #tpu.memory_space<vmem>>, vector<1x96x64xf32>
    %33 = vector.shape_cast %32 : vector<1x96x64xf32> to vector<96x64xf32>
    %c1_19 = arith.constant 1 : index
    %c0_20 = arith.constant 0 : index
    %c0_21 = arith.constant 0 : index
    %34 = vector.load %arg6[%c1_19, %c0_20, %c0_21] : memref<2x1x64xf32, #tpu.memory_space<vmem>>, vector<1x1x64xf32>
    %35 = vector.shape_cast %34 : vector<1x1x64xf32> to vector<1x64xf32>
    %cst_22 = arith.constant 0.000000e+00 : f32
    %36 = vector.broadcast %cst_22 : f32 to vector<1x32xf32>
    %37 = vector.extract_strided_slice %31 {offsets = [0, 0], sizes = [7, 32], strides = [1, 1]} : vector<8x32xf32> to vector<7x32xf32>
    %38 = tpu.concatenate %36, %37 in 0 : vector<1x32xf32>, vector<7x32xf32> -> vector<8x32xf32>
    %39 = vector.extract_strided_slice %31 {offsets = [1, 0], sizes = [7, 32], strides = [1, 1]} : vector<8x32xf32> to vector<7x32xf32>
    %cst_23 = arith.constant 0.000000e+00 : f32
    %40 = vector.broadcast %cst_23 : f32 to vector<1x32xf32>
    %41 = tpu.concatenate %39, %40 in 0 : vector<7x32xf32>, vector<1x32xf32> -> vector<8x32xf32>
    %42 = tpu.concatenate %38, %31, %41 in 1 : vector<8x32xf32>, vector<8x32xf32>, vector<8x32xf32> -> vector<8x96xf32>
    %cst_24 = arith.constant dense<0.000000e+00> : vector<8x64xf32>
    %43 = tpu.matmul %42, %33, %cst_24 {dimension_numbers = #tpu.dot_dimension_numbers<[1], [0], [0], [1], [0, 0, 1, 1], [], []>} : vector<8x96xf32>, vector<96x64xf32>, vector<8x64xf32> -> vector<8x64xf32>
    %44 = vector.broadcast %35 : vector<1x64xf32> to vector<8x64xf32>
    %45 = arith.addf %43, %44 : vector<8x64xf32>
    %46 = vector.extract_strided_slice %45 {offsets = [0, 0], sizes = [8, 32], strides = [1, 1]} : vector<8x64xf32> to vector<8x32xf32>
    %47 = vector.extract_strided_slice %45 {offsets = [0, 32], sizes = [8, 32], strides = [1, 1]} : vector<8x64xf32> to vector<8x32xf32>
    %48 = arith.negf %47 : vector<8x32xf32>
    %49 = math.exp %48 : vector<8x32xf32>
    %cst_25 = arith.constant 1.000000e+00 : f32
    %50 = vector.broadcast %cst_25 : f32 to vector<8x32xf32>
    %51 = arith.addf %50, %49 : vector<8x32xf32>
    %52 = arith.divf %50, %51 : vector<8x32xf32>
    %53 = arith.mulf %46, %52 : vector<8x32xf32>
    %54 = arith.addf %53, %31 : vector<8x32xf32>
    %cst_26 = arith.constant 0.707106769 : f32
    %55 = vector.broadcast %cst_26 : f32 to vector<8x32xf32>
    %56 = arith.mulf %54, %55 : vector<8x32xf32>
    %c0_27 = arith.constant 0 : index
    %c0_28 = arith.constant 0 : index
    %57 = vector.load %arg7[%c0_27, %c0_28] : memref<32x32xf32, #tpu.memory_space<vmem>>, vector<32x32xf32>
    %cst_29 = arith.constant dense<0.000000e+00> : vector<8x32xf32>
    %58 = tpu.matmul %56, %57, %cst_29 {dimension_numbers = #tpu.dot_dimension_numbers<[1], [0], [0], [1], [0, 0, 1, 1], [], []>} : vector<8x32xf32>, vector<32x32xf32>, vector<8x32xf32> -> vector<8x32xf32>
    %c0_30 = arith.constant 0 : index
    %c0_31 = arith.constant 0 : index
    %59 = vector.load %arg8[%c0_30, %c0_31] : memref<1x32xf32, #tpu.memory_space<vmem>>, vector<1x32xf32>
    %60 = vector.broadcast %59 : vector<1x32xf32> to vector<8x32xf32>
    %61 = arith.addf %58, %60 : vector<8x32xf32>
    %62 = arith.addf %61, %1 : vector<8x32xf32>
    %cst_32 = arith.constant 0.707106769 : f32
    %63 = vector.broadcast %cst_32 : f32 to vector<8x32xf32>
    %64 = arith.mulf %62, %63 : vector<8x32xf32>
    %c0_33 = arith.constant 0 : index
    %c0_34 = arith.constant 0 : index
    %c0_35 = arith.constant 0 : index
    %65 = vector.load %arg2[%c0_33, %c0_34, %c0_35] : memref<1x8x32xf32, #tpu.memory_space<vmem>>, vector<1x8x32xf32>
    %66 = vector.shape_cast %65 : vector<1x8x32xf32> to vector<8x32xf32>
    %c0_36 = arith.constant 0 : index
    %c0_37 = arith.constant 0 : index
    %67 = vector.load %arg9[%c0_36, %c0_37] : memref<32x32xf32, #tpu.memory_space<vmem>>, vector<32x32xf32>
    %cst_38 = arith.constant dense<0.000000e+00> : vector<8x32xf32>
    %68 = tpu.matmul %66, %67, %cst_38 {dimension_numbers = #tpu.dot_dimension_numbers<[1], [0], [0], [1], [0, 0, 1, 1], [], []>} : vector<8x32xf32>, vector<32x32xf32>, vector<8x32xf32> -> vector<8x32xf32>
    %c0_39 = arith.constant 0 : index
    %c0_40 = arith.constant 0 : index
    %69 = vector.load %arg10[%c0_39, %c0_40] : memref<1x32xf32, #tpu.memory_space<vmem>>, vector<1x32xf32>
    %70 = vector.broadcast %69 : vector<1x32xf32> to vector<8x32xf32>
    %71 = arith.addf %68, %70 : vector<8x32xf32>
    %c0_41 = arith.constant 0 : index
    %c0_42 = arith.constant 0 : index
    %c0_43 = arith.constant 0 : index
    %72 = vector.load %arg11[%c0_41, %c0_42, %c0_43] : memref<2x96x64xf32, #tpu.memory_space<vmem>>, vector<1x96x64xf32>
    %73 = vector.shape_cast %72 : vector<1x96x64xf32> to vector<96x64xf32>
    %c0_44 = arith.constant 0 : index
    %c0_45 = arith.constant 0 : index
    %c0_46 = arith.constant 0 : index
    %74 = vector.load %arg12[%c0_44, %c0_45, %c0_46] : memref<2x1x64xf32, #tpu.memory_space<vmem>>, vector<1x1x64xf32>
    %75 = vector.shape_cast %74 : vector<1x1x64xf32> to vector<1x64xf32>
    %cst_47 = arith.constant 0.000000e+00 : f32
    %76 = vector.broadcast %cst_47 : f32 to vector<2x32xf32>
    %77 = vector.extract_strided_slice %71 {offsets = [0, 0], sizes = [6, 32], strides = [1, 1]} : vector<8x32xf32> to vector<6x32xf32>
    %78 = tpu.concatenate %76, %77 in 0 : vector<2x32xf32>, vector<6x32xf32> -> vector<8x32xf32>
    %cst_48 = arith.constant 0.000000e+00 : f32
    %79 = vector.broadcast %cst_48 : f32 to vector<1x32xf32>
    %80 = vector.extract_strided_slice %71 {offsets = [0, 0], sizes = [7, 32], strides = [1, 1]} : vector<8x32xf32> to vector<7x32xf32>
    %81 = tpu.concatenate %79, %80 in 0 : vector<1x32xf32>, vector<7x32xf32> -> vector<8x32xf32>
    %82 = tpu.concatenate %78, %81, %71 in 1 : vector<8x32xf32>, vector<8x32xf32>, vector<8x32xf32> -> vector<8x96xf32>
    %cst_49 = arith.constant dense<0.000000e+00> : vector<8x64xf32>
    %83 = tpu.matmul %82, %73, %cst_49 {dimension_numbers = #tpu.dot_dimension_numbers<[1], [0], [0], [1], [0, 0, 1, 1], [], []>} : vector<8x96xf32>, vector<96x64xf32>, vector<8x64xf32> -> vector<8x64xf32>
    %84 = vector.broadcast %75 : vector<1x64xf32> to vector<8x64xf32>
    %85 = arith.addf %83, %84 : vector<8x64xf32>
    %86 = vector.extract_strided_slice %85 {offsets = [0, 0], sizes = [8, 32], strides = [1, 1]} : vector<8x64xf32> to vector<8x32xf32>
    %87 = vector.extract_strided_slice %85 {offsets = [0, 32], sizes = [8, 32], strides = [1, 1]} : vector<8x64xf32> to vector<8x32xf32>
    %88 = arith.negf %87 : vector<8x32xf32>
    %89 = math.exp %88 : vector<8x32xf32>
    %cst_50 = arith.constant 1.000000e+00 : f32
    %90 = vector.broadcast %cst_50 : f32 to vector<8x32xf32>
    %91 = arith.addf %90, %89 : vector<8x32xf32>
    %92 = arith.divf %90, %91 : vector<8x32xf32>
    %93 = arith.mulf %86, %92 : vector<8x32xf32>
    %c0_51 = arith.constant 0 : index
    %c0_52 = arith.constant 0 : index
    %94 = vector.load %arg13[%c0_51, %c0_52] : memref<32x32xf32, #tpu.memory_space<vmem>>, vector<32x32xf32>
    %cst_53 = arith.constant dense<0.000000e+00> : vector<8x32xf32>
    %95 = tpu.matmul %93, %94, %cst_53 {dimension_numbers = #tpu.dot_dimension_numbers<[1], [0], [0], [1], [0, 0, 1, 1], [], []>} : vector<8x32xf32>, vector<32x32xf32>, vector<8x32xf32> -> vector<8x32xf32>
    %c0_54 = arith.constant 0 : index
    %c0_55 = arith.constant 0 : index
    %96 = vector.load %arg14[%c0_54, %c0_55] : memref<1x32xf32, #tpu.memory_space<vmem>>, vector<1x32xf32>
    %97 = vector.broadcast %96 : vector<1x32xf32> to vector<8x32xf32>
    %98 = arith.addf %95, %97 : vector<8x32xf32>
    %99 = arith.addf %98, %66 : vector<8x32xf32>
    %cst_56 = arith.constant 0.707106769 : f32
    %100 = vector.broadcast %cst_56 : f32 to vector<8x32xf32>
    %101 = arith.mulf %99, %100 : vector<8x32xf32>
    %cst_57 = arith.constant dense<0.000000e+00> : vector<8x8xf32>
    %102 = tpu.matmul %101, %61, %cst_57 {dimension_numbers = #tpu.dot_dimension_numbers<[1], [1], [0], [0], [0, 0, 1, 0], [], []>} : vector<8x32xf32>, vector<8x32xf32>, vector<8x8xf32> -> vector<8x8xf32>
    %cst_58 = arith.constant dense<0xFF800000> : vector<8xf32>
    %103 = vector.multi_reduction <maximumf>, %102, %cst_58 [1] : vector<8x8xf32> to vector<8xf32>
    %104 = vector.shape_cast %103 : vector<8xf32> to vector<8x1xf32>
    %105 = vector.broadcast %104 : vector<8x1xf32> to vector<8x8xf32>
    %106 = arith.subf %102, %105 : vector<8x8xf32>
    %107 = math.exp %106 : vector<8x8xf32>
    %cst_59 = arith.constant dense<0.000000e+00> : vector<8xf32>
    %108 = vector.multi_reduction <add>, %107, %cst_59 [1] : vector<8x8xf32> to vector<8xf32>
    %109 = vector.shape_cast %108 : vector<8xf32> to vector<8x1xf32>
    %110 = vector.broadcast %109 : vector<8x1xf32> to vector<8x8xf32>
    %111 = arith.divf %107, %110 : vector<8x8xf32>
    %cst_60 = arith.constant dense<0.000000e+00> : vector<8x32xf32>
    %112 = tpu.matmul %111, %64, %cst_60 {dimension_numbers = #tpu.dot_dimension_numbers<[1], [0], [0], [1], [0, 0, 1, 1], [], []>} : vector<8x8xf32>, vector<8x32xf32>, vector<8x32xf32> -> vector<8x32xf32>
    %c0_61 = arith.constant 0 : index
    %c0_62 = arith.constant 0 : index
    %113 = vector.load %arg15[%c0_61, %c0_62] : memref<32x32xf32, #tpu.memory_space<vmem>>, vector<32x32xf32>
    %cst_63 = arith.constant dense<0.000000e+00> : vector<8x32xf32>
    %114 = tpu.matmul %112, %113, %cst_63 {dimension_numbers = #tpu.dot_dimension_numbers<[1], [0], [0], [1], [0, 0, 1, 1], [], []>} : vector<8x32xf32>, vector<32x32xf32>, vector<8x32xf32> -> vector<8x32xf32>
    %c0_64 = arith.constant 0 : index
    %c0_65 = arith.constant 0 : index
    %115 = vector.load %arg16[%c0_64, %c0_65] : memref<1x32xf32, #tpu.memory_space<vmem>>, vector<1x32xf32>
    %116 = vector.broadcast %115 : vector<1x32xf32> to vector<8x32xf32>
    %117 = arith.addf %114, %116 : vector<8x32xf32>
    %118 = arith.addf %93, %117 : vector<8x32xf32>
    %cst_66 = arith.constant 0.707106769 : f32
    %119 = vector.broadcast %cst_66 : f32 to vector<8x32xf32>
    %120 = arith.mulf %118, %119 : vector<8x32xf32>
    %121 = arith.addf %120, %71 : vector<8x32xf32>
    %cst_67 = arith.constant 0.707106769 : f32
    %122 = vector.broadcast %cst_67 : f32 to vector<8x32xf32>
    %123 = arith.mulf %121, %122 : vector<8x32xf32>
    %c1_68 = arith.constant 1 : index
    %c0_69 = arith.constant 0 : index
    %c0_70 = arith.constant 0 : index
    %124 = vector.load %arg11[%c1_68, %c0_69, %c0_70] : memref<2x96x64xf32, #tpu.memory_space<vmem>>, vector<1x96x64xf32>
    %125 = vector.shape_cast %124 : vector<1x96x64xf32> to vector<96x64xf32>
    %c1_71 = arith.constant 1 : index
    %c0_72 = arith.constant 0 : index
    %c0_73 = arith.constant 0 : index
    %126 = vector.load %arg12[%c1_71, %c0_72, %c0_73] : memref<2x1x64xf32, #tpu.memory_space<vmem>>, vector<1x1x64xf32>
    %127 = vector.shape_cast %126 : vector<1x1x64xf32> to vector<1x64xf32>
    %cst_74 = arith.constant 0.000000e+00 : f32
    %128 = vector.broadcast %cst_74 : f32 to vector<2x32xf32>
    %129 = vector.extract_strided_slice %123 {offsets = [0, 0], sizes = [6, 32], strides = [1, 1]} : vector<8x32xf32> to vector<6x32xf32>
    %130 = tpu.concatenate %128, %129 in 0 : vector<2x32xf32>, vector<6x32xf32> -> vector<8x32xf32>
    %cst_75 = arith.constant 0.000000e+00 : f32
    %131 = vector.broadcast %cst_75 : f32 to vector<1x32xf32>
    %132 = vector.extract_strided_slice %123 {offsets = [0, 0], sizes = [7, 32], strides = [1, 1]} : vector<8x32xf32> to vector<7x32xf32>
    %133 = tpu.concatenate %131, %132 in 0 : vector<1x32xf32>, vector<7x32xf32> -> vector<8x32xf32>
    %134 = tpu.concatenate %130, %133, %123 in 1 : vector<8x32xf32>, vector<8x32xf32>, vector<8x32xf32> -> vector<8x96xf32>
    %cst_76 = arith.constant dense<0.000000e+00> : vector<8x64xf32>
    %135 = tpu.matmul %134, %125, %cst_76 {dimension_numbers = #tpu.dot_dimension_numbers<[1], [0], [0], [1], [0, 0, 1, 1], [], []>} : vector<8x96xf32>, vector<96x64xf32>, vector<8x64xf32> -> vector<8x64xf32>
    %136 = vector.broadcast %127 : vector<1x64xf32> to vector<8x64xf32>
    %137 = arith.addf %135, %136 : vector<8x64xf32>
    %138 = vector.extract_strided_slice %137 {offsets = [0, 0], sizes = [8, 32], strides = [1, 1]} : vector<8x64xf32> to vector<8x32xf32>
    %139 = vector.extract_strided_slice %137 {offsets = [0, 32], sizes = [8, 32], strides = [1, 1]} : vector<8x64xf32> to vector<8x32xf32>
    %140 = arith.negf %139 : vector<8x32xf32>
    %141 = math.exp %140 : vector<8x32xf32>
    %cst_77 = arith.constant 1.000000e+00 : f32
    %142 = vector.broadcast %cst_77 : f32 to vector<8x32xf32>
    %143 = arith.addf %142, %141 : vector<8x32xf32>
    %144 = arith.divf %142, %143 : vector<8x32xf32>
    %145 = arith.mulf %138, %144 : vector<8x32xf32>
    %c0_78 = arith.constant 0 : index
    %c0_79 = arith.constant 0 : index
    %146 = vector.load %arg13[%c0_78, %c0_79] : memref<32x32xf32, #tpu.memory_space<vmem>>, vector<32x32xf32>
    %cst_80 = arith.constant dense<0.000000e+00> : vector<8x32xf32>
    %147 = tpu.matmul %145, %146, %cst_80 {dimension_numbers = #tpu.dot_dimension_numbers<[1], [0], [0], [1], [0, 0, 1, 1], [], []>} : vector<8x32xf32>, vector<32x32xf32>, vector<8x32xf32> -> vector<8x32xf32>
    %c0_81 = arith.constant 0 : index
    %c0_82 = arith.constant 0 : index
    %148 = vector.load %arg14[%c0_81, %c0_82] : memref<1x32xf32, #tpu.memory_space<vmem>>, vector<1x32xf32>
    %149 = vector.broadcast %148 : vector<1x32xf32> to vector<8x32xf32>
    %150 = arith.addf %147, %149 : vector<8x32xf32>
    %151 = arith.addf %150, %66 : vector<8x32xf32>
    %cst_83 = arith.constant 0.707106769 : f32
    %152 = vector.broadcast %cst_83 : f32 to vector<8x32xf32>
    %153 = arith.mulf %151, %152 : vector<8x32xf32>
    %cst_84 = arith.constant dense<0.000000e+00> : vector<8x8xf32>
    %154 = tpu.matmul %153, %61, %cst_84 {dimension_numbers = #tpu.dot_dimension_numbers<[1], [1], [0], [0], [0, 0, 1, 0], [], []>} : vector<8x32xf32>, vector<8x32xf32>, vector<8x8xf32> -> vector<8x8xf32>
    %cst_85 = arith.constant dense<0xFF800000> : vector<8xf32>
    %155 = vector.multi_reduction <maximumf>, %154, %cst_85 [1] : vector<8x8xf32> to vector<8xf32>
    %156 = vector.shape_cast %155 : vector<8xf32> to vector<8x1xf32>
    %157 = vector.broadcast %156 : vector<8x1xf32> to vector<8x8xf32>
    %158 = arith.subf %154, %157 : vector<8x8xf32>
    %159 = math.exp %158 : vector<8x8xf32>
    %cst_86 = arith.constant dense<0.000000e+00> : vector<8xf32>
    %160 = vector.multi_reduction <add>, %159, %cst_86 [1] : vector<8x8xf32> to vector<8xf32>
    %161 = vector.shape_cast %160 : vector<8xf32> to vector<8x1xf32>
    %162 = vector.broadcast %161 : vector<8x1xf32> to vector<8x8xf32>
    %163 = arith.divf %159, %162 : vector<8x8xf32>
    %cst_87 = arith.constant dense<0.000000e+00> : vector<8x32xf32>
    %164 = tpu.matmul %163, %64, %cst_87 {dimension_numbers = #tpu.dot_dimension_numbers<[1], [0], [0], [1], [0, 0, 1, 1], [], []>} : vector<8x8xf32>, vector<8x32xf32>, vector<8x32xf32> -> vector<8x32xf32>
    %c0_88 = arith.constant 0 : index
    %c0_89 = arith.constant 0 : index
    %165 = vector.load %arg15[%c0_88, %c0_89] : memref<32x32xf32, #tpu.memory_space<vmem>>, vector<32x32xf32>
    %cst_90 = arith.constant dense<0.000000e+00> : vector<8x32xf32>
    %166 = tpu.matmul %164, %165, %cst_90 {dimension_numbers = #tpu.dot_dimension_numbers<[1], [0], [0], [1], [0, 0, 1, 1], [], []>} : vector<8x32xf32>, vector<32x32xf32>, vector<8x32xf32> -> vector<8x32xf32>
    %c0_91 = arith.constant 0 : index
    %c0_92 = arith.constant 0 : index
    %167 = vector.load %arg16[%c0_91, %c0_92] : memref<1x32xf32, #tpu.memory_space<vmem>>, vector<1x32xf32>
    %168 = vector.broadcast %167 : vector<1x32xf32> to vector<8x32xf32>
    %169 = arith.addf %166, %168 : vector<8x32xf32>
    %170 = arith.addf %145, %169 : vector<8x32xf32>
    %cst_93 = arith.constant 0.707106769 : f32
    %171 = vector.broadcast %cst_93 : f32 to vector<8x32xf32>
    %172 = arith.mulf %170, %171 : vector<8x32xf32>
    %173 = arith.addf %172, %123 : vector<8x32xf32>
    %cst_94 = arith.constant 0.707106769 : f32
    %174 = vector.broadcast %cst_94 : f32 to vector<8x32xf32>
    %175 = arith.mulf %173, %174 : vector<8x32xf32>
    %c0_95 = arith.constant 0 : index
    %c0_96 = arith.constant 0 : index
    %176 = vector.load %arg17[%c0_95, %c0_96] : memref<32x32xf32, #tpu.memory_space<vmem>>, vector<32x32xf32>
    %cst_97 = arith.constant dense<0.000000e+00> : vector<8x32xf32>
    %177 = tpu.matmul %175, %176, %cst_97 {dimension_numbers = #tpu.dot_dimension_numbers<[1], [0], [0], [1], [0, 0, 1, 1], [], []>} : vector<8x32xf32>, vector<32x32xf32>, vector<8x32xf32> -> vector<8x32xf32>
    %c0_98 = arith.constant 0 : index
    %c0_99 = arith.constant 0 : index
    %178 = vector.load %arg18[%c0_98, %c0_99] : memref<1x32xf32, #tpu.memory_space<vmem>>, vector<1x32xf32>
    %179 = vector.broadcast %178 : vector<1x32xf32> to vector<8x32xf32>
    %180 = arith.addf %177, %179 : vector<8x32xf32>
    %c0_100 = arith.constant 0 : index
    %c0_101 = arith.constant 0 : index
    %181 = vector.load %arg19[%c0_100, %c0_101] : memref<32x128xf32, #tpu.memory_space<vmem>>, vector<32x128xf32>
    %cst_102 = arith.constant dense<0.000000e+00> : vector<8x128xf32>
    %182 = tpu.matmul %180, %181, %cst_102 {dimension_numbers = #tpu.dot_dimension_numbers<[1], [0], [0], [1], [0, 0, 1, 1], [], []>} : vector<8x32xf32>, vector<32x128xf32>, vector<8x128xf32> -> vector<8x128xf32>
    %c0_103 = arith.constant 0 : index
    %c0_104 = arith.constant 0 : index
    %183 = vector.load %arg20[%c0_103, %c0_104] : memref<1x128xf32, #tpu.memory_space<vmem>>, vector<1x128xf32>
    %184 = vector.broadcast %183 : vector<1x128xf32> to vector<8x128xf32>
    %185 = arith.addf %182, %184 : vector<8x128xf32>
    %c0_105 = arith.constant 0 : index
    %c0_106 = arith.constant 0 : index
    %c0_107 = arith.constant 0 : index
    %186 = vector.load %arg21[%c0_105, %c0_106, %c0_107] : memref<1x8x128xf32, #tpu.memory_space<vmem>>, vector<1x8x128xf32>
    %187 = vector.shape_cast %186 : vector<1x8x128xf32> to vector<8x128xf32>
    %188 = vector.shape_cast %185 : vector<8x128xf32> to vector<1x8x128xf32>
    tpu.vector_store %arg21[%c0_105, %c0_106, %c0_107], %188 {strides = array<i32>} : memref<1x8x128xf32, #tpu.memory_space<vmem>>, vector<1x8x128xf32>,
    %cst_108 = arith.constant 0.000000e+00 : f32
    %189 = vector.broadcast %cst_108 : f32 to vector<8x120xf32>
    %190 = tpu.concatenate %163, %189 in 1 : vector<8x8xf32>, vector<8x120xf32> -> vector<8x128xf32>
    %c0_109 = arith.constant 0 : index
    %c0_110 = arith.constant 0 : index
    %c0_111 = arith.constant 0 : index
    %191 = vector.load %arg22[%c0_109, %c0_110, %c0_111] : memref<1x8x128xf32, #tpu.memory_space<vmem>>, vector<1x8x128xf32>
    %192 = vector.shape_cast %191 : vector<1x8x128xf32> to vector<8x128xf32>
    %193 = vector.shape_cast %190 : vector<8x128xf32> to vector<1x8x128xf32>
    tpu.vector_store %arg22[%c0_109, %c0_110, %c0_111], %193 {strides = array<i32>} : memref<1x8x128xf32, #tpu.memory_space<vmem>>, vector<1x8x128xf32>,
    return
  }
  func.func @transform_0(%arg0: i32) -> (i32, i32, i32) {
    %c0_i32 = arith.constant 0 : i32
    %c0_i32_0 = arith.constant 0 : i32
    %c0_i32_1 = arith.constant 0 : i32
    return %arg0, %c0_i32, %c0_i32_0 : i32, i32, i32
  }
  func.func @transform_1(%arg0: i32) -> (i32, i32, i32) {
    %c0_i32 = arith.constant 0 : i32
    %c0_i32_0 = arith.constant 0 : i32
    %c0_i32_1 = arith.constant 0 : i32
    return %arg0, %c0_i32, %c0_i32_0 : i32, i32, i32
  }
  func.func @transform_2(%arg0: i32) -> (i32, i32) {
    %c0_i32 = arith.constant 0 : i32
    %c0_i32_0 = arith.constant 0 : i32
    %c0_i32_1 = arith.constant 0 : i32
    return %c0_i32, %c0_i32_0 : i32, i32
  }
  func.func @transform_3(%arg0: i32) -> (i32, i32) {
    %c0_i32 = arith.constant 0 : i32
    %c0_i32_0 = arith.constant 0 : i32
    %c0_i32_1 = arith.constant 0 : i32
    return %c0_i32, %c0_i32_0 : i32, i32
  }
  func.func @transform_4(%arg0: i32) -> (i32, i32, i32) {
    %c0_i32 = arith.constant 0 : i32
    %c0_i32_0 = arith.constant 0 : i32
    %c0_i32_1 = arith.constant 0 : i32
    %c0_i32_2 = arith.constant 0 : i32
    return %c0_i32, %c0_i32_0, %c0_i32_1 : i32, i32, i32
  }
  func.func @transform_5(%arg0: i32) -> (i32, i32, i32) {
    %c0_i32 = arith.constant 0 : i32
    %c0_i32_0 = arith.constant 0 : i32
    %c0_i32_1 = arith.constant 0 : i32
    %c0_i32_2 = arith.constant 0 : i32
    return %c0_i32, %c0_i32_0, %c0_i32_1 : i32, i32, i32
  }
  func.func @transform_6(%arg0: i32) -> (i32, i32) {
    %c0_i32 = arith.constant 0 : i32
    %c0_i32_0 = arith.constant 0 : i32
    %c0_i32_1 = arith.constant 0 : i32
    return %c0_i32, %c0_i32_0 : i32, i32
  }
  func.func @transform_7(%arg0: i32) -> (i32, i32) {
    %c0_i32 = arith.constant 0 : i32
    %c0_i32_0 = arith.constant 0 : i32
    %c0_i32_1 = arith.constant 0 : i32
    return %c0_i32, %c0_i32_0 : i32, i32
  }
  func.func @transform_8(%arg0: i32) -> (i32, i32) {
    %c0_i32 = arith.constant 0 : i32
    %c0_i32_0 = arith.constant 0 : i32
    %c0_i32_1 = arith.constant 0 : i32
    return %c0_i32, %c0_i32_0 : i32, i32
  }
  func.func @transform_9(%arg0: i32) -> (i32, i32) {
    %c0_i32 = arith.constant 0 : i32
    %c0_i32_0 = arith.constant 0 : i32
    %c0_i32_1 = arith.constant 0 : i32
    return %c0_i32, %c0_i32_0 : i32, i32
  }
  func.func @transform_10(%arg0: i32) -> (i32, i32, i32) {
    %c0_i32 = arith.constant 0 : i32
    %c0_i32_0 = arith.constant 0 : i32
    %c0_i32_1 = arith.constant 0 : i32
    %c0_i32_2 = arith.constant 0 : i32
    return %c0_i32, %c0_i32_0, %c0_i32_1 : i32, i32, i32
  }
  func.func @transform_11(%arg0: i32) -> (i32, i32, i32) {
    %c0_i32 = arith.constant 0 : i32
    %c0_i32_0 = arith.constant 0 : i32
    %c0_i32_1 = arith.constant 0 : i32
    %c0_i32_2 = arith.constant 0 : i32
    return %c0_i32, %c0_i32_0, %c0_i32_1 : i32, i32, i32
  }
  func.func @transform_12(%arg0: i32) -> (i32, i32) {
    %c0_i32 = arith.constant 0 : i32
    %c0_i32_0 = arith.constant 0 : i32
    %c0_i32_1 = arith.constant 0 : i32
    return %c0_i32, %c0_i32_0 : i32, i32
  }
  func.func @transform_13(%arg0: i32) -> (i32, i32) {
    %c0_i32 = arith.constant 0 : i32
    %c0_i32_0 = arith.constant 0 : i32
    %c0_i32_1 = arith.constant 0 : i32
    return %c0_i32, %c0_i32_0 : i32, i32
  }
  func.func @transform_14(%arg0: i32) -> (i32, i32) {
    %c0_i32 = arith.constant 0 : i32
    %c0_i32_0 = arith.constant 0 : i32
    %c0_i32_1 = arith.constant 0 : i32
    return %c0_i32, %c0_i32_0 : i32, i32
  }
  func.func @transform_15(%arg0: i32) -> (i32, i32) {
    %c0_i32 = arith.constant 0 : i32
    %c0_i32_0 = arith.constant 0 : i32
    %c0_i32_1 = arith.constant 0 : i32
    return %c0_i32, %c0_i32_0 : i32, i32
  }
  func.func @transform_16(%arg0: i32) -> (i32, i32) {
    %c0_i32 = arith.constant 0 : i32
    %c0_i32_0 = arith.constant 0 : i32
    %c0_i32_1 = arith.constant 0 : i32
    return %c0_i32, %c0_i32_0 : i32, i32
  }
  func.func @transform_17(%arg0: i32) -> (i32, i32) {
    %c0_i32 = arith.constant 0 : i32
    %c0_i32_0 = arith.constant 0 : i32
    %c0_i32_1 = arith.constant 0 : i32
    return %c0_i32, %c0_i32_0 : i32, i32
  }
  func.func @transform_18(%arg0: i32) -> (i32, i32) {
    %c0_i32 = arith.constant 0 : i32
    %c0_i32_0 = arith.constant 0 : i32
    %c0_i32_1 = arith.constant 0 : i32
    return %c0_i32, %c0_i32_0 : i32, i32
  }
  func.func @transform_19(%arg0: i32) -> (i32, i32) {
    %c0_i32 = arith.constant 0 : i32
    %c0_i32_0 = arith.constant 0 : i32
    %c0_i32_1 = arith.constant 0 : i32
    return %c0_i32, %c0_i32_0 : i32, i32
  }
  func.func @transform_20(%arg0: i32) -> (i32, i32, i32) {
    %c0_i32 = arith.constant 0 : i32
    %c0_i32_0 = arith.constant 0 : i32
    %c0_i32_1 = arith.constant 0 : i32
    return %arg0, %c0_i32, %c0_i32_0 : i32, i32, i32
  }
  func.func @transform_21(%arg0: i32) -> (i32, i32, i32) {
    %c0_i32 = arith.constant 0 : i32
    %c0_i32_0 = arith.constant 0 : i32
    %c0_i32_1 = arith.constant 0 : i32
    return %arg0, %c0_i32, %c0_i32_0 : i32, i32, i32
  }
}

</mosaic_0001>

<bundles_post_ra>
// kernel: seq2seq_forward.1
= control target key start
LH: loop header
LB: loop body
LE: loop exit
PB: predicated region body
PF: predicated region fallthrough
CT: control target
= control target key end

     0   :  { %s2420_s0 = inlined_call_operand.vmem [shape: f32[2,8,32], index: 0, kind: input, shape index: {}]   ;;  %s2421_s1 = inlined_call_operand.vmem [shape: f32[2,8,32], index: 1, kind: input, shape index: {}]   ;;  %s2422_s2 = inlined_call_operand.vmem [shape: f32[32,32], index: 2, kind: input, shape index: {}]   ;;  %s2423_s3 = inlined_call_operand.vmem [shape: f32[1,32], index: 3, kind: input, shape index: {}]   ;;  %s2424_s4 = inlined_call_operand.vmem [shape: f32[2,96,64], index: 4, kind: input, shape index: {}]   ;;  %s2425_s5 = inlined_call_operand.vmem [shape: f32[2,1,64], index: 5, kind: input, shape index: {}]   ;;  %s2426_s6 = inlined_call_operand.vmem [shape: f32[32,32], index: 6, kind: input, shape index: {}]   ;;  %s2427_s7 = inlined_call_operand.vmem [shape: f32[1,32], index: 7, kind: input, shape index: {}]   ;;  %s2428_s8 = inlined_call_operand.vmem [shape: f32[32,32], index: 8, kind: input, shape index: {}]   ;;  %s2429_s9 = inlined_call_operand.vmem [shape: f32[1,32], index: 9, kind: input, shape index: {}]   ;;  %s2430_s10 = inlined_call_operand.vmem [shape: f32[2,96,64], index: 10, kind: input, shape index: {}]   ;;  %s2431_s11 = inlined_call_operand.vmem [shape: f32[2,1,64], index: 11, kind: input, shape index: {}]   ;;  %s2432_s12 = inlined_call_operand.vmem [shape: f32[32,32], index: 12, kind: input, shape index: {}]   ;;  %s2433_s13 = inlined_call_operand.vmem [shape: f32[1,32], index: 13, kind: input, shape index: {}]   ;;  %s2434_s14 = inlined_call_operand.vmem [shape: f32[32,32], index: 14, kind: input, shape index: {}]   ;;  %s2435_s15 = inlined_call_operand.vmem [shape: f32[1,32], index: 15, kind: input, shape index: {}]   ;;  %s2436_s16 = inlined_call_operand.vmem [shape: f32[32,32], index: 16, kind: input, shape index: {}]   ;;  %s2437_s17 = inlined_call_operand.vmem [shape: f32[1,32], index: 17, kind: input, shape index: {}]   ;;  %s2438_s18 = inlined_call_operand.vmem [shape: f32[32,128], index: 18, kind: input, shape index: {}]   ;;  %s2439_s19 = inlined_call_operand.vmem [shape: f32[1,128], index: 19, kind: input, shape index: {}]   ;;  %s2440_s20 = inlined_call_operand.hbm [shape: f32[2,8,128], index: 20, kind: output, shape index: {0}]   ;;  %s2441_s21 = inlined_call_operand.hbm [shape: f32[2,8,128], index: 21, kind: output, shape index: {1}]  }
   0x1   :  { %2463 = sst [smem:[#allocation15_spill]] %s2420_s0 }
   0x2   :  { %2464 = sst [smem:[#allocation16_spill]] %s2421_s1 }
   0x3   :  { %2465 = sst [smem:[#allocation17_spill]] %s2422_s2 }
   0x4   :  { %2466 = sst [smem:[#allocation18_spill]] %s2423_s3 }
   0x5   :  { %2467 = sst [smem:[#allocation19_spill]] %s2424_s4 }
   0x6   :  { %2468 = sst [smem:[#allocation20_spill]] %s2425_s5 }
   0x7   :  { %2469 = sst [smem:[#allocation21_spill]] %s2426_s6 }
   0x8   :  { %2470 = sst [smem:[#allocation22_spill]] %s2427_s7 }
   0x9   :  { %2471 = sst [smem:[#allocation23_spill]] %s2428_s8 }
   0xa   :  { %2472 = sst [smem:[#allocation24_spill]] %s2429_s9 }
   0xb   :  { %2473 = sst [smem:[#allocation25_spill]] %s2439_s19 }
   0xc   :  { %2474 = sst [smem:[#allocation26_spill]] %s2440_s20 }
   0xd   :  { %2475 = sst [smem:[#allocation27_spill]] %s2441_s21 }
   0xe   :  { %27 = vsyncpa [#allocation3], 0 }
   0xf   :  { %29 = vsyncpa [#allocation3 + $0x1], 0 }
  0x10   :  { %30 = vsyncpa [#allocation5], 0 }
  0x11   :  { %32 = vsyncpa [#allocation5 + $0x1], 0  ;;  %s1929_s2 = smov 0   ;;  %s1931_s25 = smov 0  }
  0x12   :  { %s1933_s26 = smov 0   ;;  %s1935_s27 = smov 0  }
  0x13 LB: > { %2476 = sst [smem:[#allocation8_spill]] %s1802_s2  ;;  %s1950_s3 = sadd.s32 4294967295, %s1814_s27   ;;  %s1814_s27 = sphi %s1935_s27, %s2507_s27   ;;  %s1810_s26 = sphi %s1933_s26, %s2509_s26   ;;  %s1806_s25 = sphi %s1931_s25, %s2511_s25   ;;  %s1802_s2 = sphi %s1929_s2, %s2510_s2  }
  0x14   : > { %2477 = sst [smem:[#allocation9_spill]] %s1810_s26  ;;  %s1575_s28 = sadd.s32 4294967294, %s1814_s27  }
  0x15   : > { %2478 = sst [smem:[#allocation10_spill]] %s1814_s27  ;;  %s1954_s29 = sadd.s32 1, %s1814_s27  }
  0x16   : > { %2479 = sst [smem:[#allocation11_spill]] %s1954_s29  ;;  %s475_s0 = sadd.s32 1, %s1810_s26 }
  0x17   : > { %s472_s4 = ssub.s32 %s1814_s27, %s1954_s29  ;;  %p485_p0 = scmp.ne.s32.totalorder %s1810_s26, %s1806_s25 }
  0x18   : > { %p473_p1 = scmp.eq.s32.totalorder %s472_s4, 0  ;;  %p486_p2 = scmp.eq.s32.totalorder %s1950_s3, 1 }
  0x19   : > { %p491_p3 = scmp.ne.s32.totalorder %s1806_s25, %s1802_s2  ;;  %p492_p4 = scmp.eq.s32.totalorder %s1575_s28, 1 }
  0x1a   : > { %s1965_s30 = scalar_select %p473_p1, %s1810_s26, %s475_s0  }
  0x1b   : > { %p1967_p5 = por %p486_p2, %p485_p0  ;;  %p1971_p6 = por %p492_p4, %p491_p3 }
  0x1c   : > { %2480 = sst [smem:[#allocation12_spill]] %s1965_s30  ;;  %p1578_p7 = scmp.ge.s32.totalorder %s1814_s27, 1 }
  0x1d   : > { %s2481_s5 = scalar_select %p1967_p5, 1, 0 }
  0x1e   : > { %s2483_s22 = scalar_select %p1971_p6, 1, 0 }
  0x1f   : > { %2482 = sst [smem:[#allocation13_spill]] %s2481_s5  ;;  %p604_p8 = scmp.lt.s32.totalorder %s1814_s27, 3 }
  0x20   : > { %2484 = sst [smem:[#allocation14_spill]] %s2483_s22 }
  0x21   : > { %p605_p9 = pnand %p1578_p7, %p604_p8 }
  0x22   : > { %s2485_s24 = sld [smem:[#allocation17_spill]] (!%p605_p9)  ;;  %p672_p10 = scmp.lt.s32.totalorder (!%p605_p9), %s1950_s3, 1 }
  0x23   : > { %608 = sbr.rel (%p605_p9) target bundleno = 3425 (0xd61), region = 100  ;;  %s2486_s22 = sld [smem:[#allocation15_spill]] (!%p605_p9) }
  0x24   : > { %s2487_s27 = sld [smem:[#allocation19_spill]] (!%p605_p9)  ;;  %s2497_s28 = smov (!%p605_p9), 96  }
  0x25   : > { %s2489_s1 = sld [smem:[#allocation18_spill]] (!%p605_p9) }
  0x26   : > { %s2491_s8 = sld [smem:[#allocation23_spill]] (!%p605_p9) }
  0x27   : > { %s2495_s9 = sld [smem:[#allocation24_spill]] (!%p605_p9) }
  0x28   : > { %v684_v0 = vld [vmem:[%s2485_s24 + $0x18] sm:$0xff]  ;;  %v683_v1 = vld [vmem:[%s2485_s24 + $0x10] sm:$0xff]  ;;  %v682_v2 = vld [vmem:[%s2485_s24 + $0x8] sm:$0xff]  ;;  %s1988_s26 = scalar_select %p672_p10, %s1950_s3, 1  ;;  %vm689_vm0 = vcmask 261120   ;;  %vm733_vm1 = vcmask 1046528  }
  0x29   : > { %705 = vmatpush.msra.mxu0 %v684_v0  ;;  %v681_v3 = vld [vmem:[%s2485_s24] sm:$0xff]  ;;  %vm729_vm2 = vcmask 1040384   ;;  %vm743_vm3 = vcmask 523264   ;;  %vm748_vm4 = vcmask 785408   ;;  %s2496_s6 = sld [smem:[#allocation21_spill]]  ;;  %vm962_vm13 = vcmask 1041408  }
  0x2a   : > { %s1581_s29 = sshll.u32 %s1988_s26, 3  ;;  %s2488_s19 = smov %s2487_s27  ;;  %v724_v5 = vld [vmem:[%s2487_s27 + $0x58] sm:$0xff] }
  0x2b   : > { %706 = vmatpush.msra.mxu0 %v683_v1  ;;  %s675_s2 = scalar_lea.vmem %s2486_s22, %s1581_s29  ;;  %v723_v6 = vld [vmem:[%s2488_s19 + $0x50] sm:$0xff]  ;;  %756 = vmatpush.msra.mxu1 %v724_v5  ;;  %v722_v7 = vld [vmem:[%s2488_s19 + $0x48] sm:$0xff]  ;;  %v721_v8 = vld [vmem:[%s2488_s19 + $0x40] sm:$0xff]  ;;  %s2453_s22 = smov 64  }
  0x2c   : > { %v1999_v4 = vld [vmem:[%s675_s2] sm:$0xff]  ;;  %v720_v9 = vld [vmem:[%s2488_s19 + $0x38] sm:$0xff]  ;;  %v719_v10 = vld [vmem:[%s2488_s19 + $0x30] sm:$0xff]  ;;  %s2455_s2 = smov 32   ;;  %s2458_s27 = smov 96  }
  0x2d   : > { %707 = vmatpush.msra.mxu0 %v682_v2  ;;  %757 = vmatpush.msra.mxu1 %v723_v6  ;;  %v718_v11 = vld [vmem:[%s2488_s19 + $0x28] sm:$0xff]  ;;  %v1685_v12 = vld [vmem:[%s2489_s1] ss:$0 sm:$0xff]  ;;  %v716_v18 = vld [vmem:[%s2488_s19 + $0x18] sm:$0xff]  ;;  %s2493_s26 = smov 32   ;;  %s2498_s7 = sld [smem:[#allocation22_spill]] }
  0x2e   : > { %v717_v17 = vld [vmem:[%s2488_s19 + $0x20] sm:$0xff]  ;;  %v715_v19 = vld [vmem:[%s2488_s19 + $0x10] sm:$0xff]  ;;  %v714_v20 = vld [vmem:[%s2488_s19 + $0x8] sm:$0xff]  ;;  %s2500_s23 = sld [smem:[#allocation27_spill]] }
  0x2f   : > { %708 = vmatpush.msra.mxu0 %v681_v3  ;;  %758 = vmatpush.msra.mxu1 %v722_v7  ;;  %v713_v21 = vld [vmem:[%s2488_s19] sm:$0xff]  ;;  %v918_v44 = vld [vmem:[%s2491_s8 + $0x18] sm:$0xff]  ;;  %v917_v45 = vld [vmem:[%s2491_s8 + $0x10] sm:$0xff] }
  0x30   : > { %1583 = vmatmul.msk.f32.vlgmr.msra.gmra.mxu0 %vm689_vm0, %v1999_v4  ;;  %v916_v46 = vld [vmem:[%s2491_s8 + $0x8] sm:$0xff]  ;;  %v915_v47 = vld [vmem:[%s2491_s8] sm:$0xff]  ;;  %v1597_v55 = vld [vmem:[%s2488_s19 + $0xb8] sm:$0xff] }
  0x31   : > { %759 = vmatpush.msra.mxu1 %v721_v8  ;;  %938 = vmatpush.msrb.mxu0 %v918_v44  ;;  %v1596_v56 = vld [vmem:[%s2488_s19 + $0xb0] sm:$0xff]  ;;  %v1595_v57 = vld [vmem:[%s2488_s19 + $0xa8] sm:$0xff]  ;;  %v1594_v58 = vld [vmem:[%s2488_s19 + $0xa0] sm:$0xff] }
  0x32   : > { %839 = vmatpush.msra.mxu2 %v1597_v55  ;;  %v1593_v59 = vld [vmem:[%s2488_s19 + $0x98] sm:$0xff]  ;;  %v1592_v60 = vld [vmem:[%s2488_s19 + $0x90] sm:$0xff]  ;;  %v1591_v61 = vld [vmem:[%s2488_s19 + $0x88] sm:$0xff] }
  0x33   : > { %760 = vmatpush.msra.mxu1 %v720_v9  ;;  %939 = vmatpush.msrb.mxu0 %v917_v45  ;;  %v1590_v62 = vld [vmem:[%s2488_s19 + $0x80] sm:$0xff]  ;;  %v1589_v63 = vld [vmem:[%s2488_s19 + $0x78] sm:$0xff]  ;;  %v1588_v0 = vld [vmem:[%s2488_s19 + $0x70] sm:$0xff] }
  0x34   : > { %840 = vmatpush.msra.mxu2 %v1596_v56  ;;  %v1587_v1 = vld [vmem:[%s2488_s19 + $0x68] sm:$0xff]  ;;  %v1586_v2 = vld [vmem:[%s2488_s19 + $0x60] sm:$0xff]  ;;  %v948_v44 = vld [vmem:[%s2430_s10 + $0x10] sm:$0xff] }
  0x35   : > { %761 = vmatpush.msra.mxu1 %v719_v10  ;;  %940 = vmatpush.msrb.mxu0 %v916_v46  ;;  %v1687_v3 = vld [vmem:[%s2495_s9] ss:$0 sm:$0xff]  ;;  %v947_v45 = vld [vmem:[%s2430_s10 + $0x8] sm:$0xff] }
  0x36   : > { %841 = vmatpush.msra.mxu2 %v1595_v57  ;;  %v946_v46 = vld [vmem:[%s2430_s10] sm:$0xff] }
  0x37   : > { %762 = vmatpush.msra.mxu1 %v718_v11  ;;  %941 = vmatpush.msrb.mxu0 %v915_v47  ;;  %v1029_v47 = vld [vmem:[%s2432_s12 + $0x18] sm:$0xff] }
  0x38   : > { %842 = vmatpush.msra.mxu2 %v1594_v58 }
  0x39   : > { %763 = vmatpush.msra.mxu1 %v717_v17  ;;  %v883_v17 = vld [vmem:[%s2496_s6 + $0x10] sm:$0xff]  ;;  %1049 = vmatpush.msra.mxu0 %v1029_v47 }
  0x3a   : > { %843 = vmatpush.msra.mxu2 %v1593_v59 }
  0x3b   : > { %764 = vmatpush.msra.mxu1 %v716_v18 }
  0x3c   : > { %844 = vmatpush.msra.mxu2 %v1592_v60 }
  0x3d   : > { %765 = vmatpush.msra.mxu1 %v715_v19 }
  0x3e   : > { %845 = vmatpush.msra.mxu2 %v1591_v61 }
  0x3f   : > { %766 = vmatpush.msra.mxu1 %v714_v20  ;;  %v882_v20 = vld [vmem:[%s2496_s6 + $0x8] sm:$0xff] }
  0x40   : > { %846 = vmatpush.msra.mxu2 %v1590_v62 }
  0x41   : > { %767 = vmatpush.msra.mxu1 %v713_v21 }
  0x42   : > { %847 = vmatpush.msra.mxu2 %v1589_v63  ;;  %v2221_v63 = vld [vmem:[%s2434_s14 + $0x8] sm:$0xff] }
  0x44   : > { %848 = vmatpush.msra.mxu2 %v1588_v0  ;;  %v1026_v0 = vld [vmem:[%s2432_s12] sm:$0xff] }
  0x46   : > { %849 = vmatpush.msra.mxu2 %v1587_v1  ;;  %v2230_v1 = vld [vmem:[%s2434_s14] sm:$0xff] }
  0x48   : > { %850 = vmatpush.msra.mxu2 %v1586_v2  ;;  %v1689_v2 = vld [vmem:[%s2498_s7] ss:$0 sm:$0xff] }
  0xad   : > { %v710_v13 = vpop.f32.mrf.mxu0 }
  0xae   : > { %v2027_v14 = vadd.f32 %v1685_v12, %v710_v13 }
  0xb0   : > { %735 = vrot.lane.b32.xlu0 %v2027_v14, %s2455_s2  ;;  %v731_v15 = vrot.slane %v2027_v14, 1  ;;  %v727_v23 = vrot.slane %v2027_v14, 7  ;;  %s2492_s2 = sld [smem:[#allocation16_spill]] }
  0xb2   : > { %v734_v16 = vsel %vm733_vm1, %v731_v15, 0.0  ;;  %v730_v24 = vsel %vm729_vm2, 0.0, %v727_v23  ;;  %v957_v23 = vld [vmem:[%s2430_s10 + $0x58] sm:$0xff] }
  0xb6   : > { %s679_s21 = scalar_lea.vmem %s2492_s2, %s1581_s29  ;;  %s2494_s29 = smov 64  }
  0xb7   : > { %v2075_v48 = vld [vmem:[%s679_s21] sm:$0xff] }
  0xb8   : > { %739 = vrot.lane.b32.xlu0 %v734_v16, %s2453_s22  ;;  %s2490_s22 = sld [smem:[#allocation20_spill]]  ;;  %1602 = vmatmul.msk.f32.vlgmr.msrb.gmra.mxu0 %vm689_vm0, %v2075_v48  ;;  %v884_v16 = vld [vmem:[%s2496_s6 + $0x18] sm:$0xff] }
  0xb9   : > { %904 = vmatpush.msra.mxu3 %v884_v16 }
  0xbb   : > { %905 = vmatpush.msra.mxu3 %v883_v17 }
  0xbd   : > { %906 = vmatpush.msra.mxu3 %v882_v20 }
  0xbe   : > { %v1686_v28 = vld [vmem:[%s2490_s22] ss:$0 sm:$0xff]  ;;  %v1688_v15 = vld [vmem:[%s2490_s22 + $0x1] ss:$0 sm:$0xff] }
 0x122   : > { %v736_v22 = vpop.permute.xlu0 %735 }
 0x123   : > { %v742_v25 = vsel %vm689_vm0, %v730_v24, %v736_v22  ;;  %v881_v22 = vld [vmem:[%s2496_s6] sm:$0xff]  ;;  %v956_v24 = vld [vmem:[%s2430_s10 + $0x50] sm:$0xff] }
 0x124   : > { %907 = vmatpush.msra.mxu3 %v881_v22 }
 0x126   : > { %986 = vmatpush.msrb.mxu3 %v957_v23 }
 0x128   : > { %987 = vmatpush.msrb.mxu3 %v956_v24 }
 0x12a   : > { %v740_v26 = vpop.permute.xlu0 %739 }
 0x12b   : > { %v744_v27 = vsel %vm743_vm3, %v742_v25, %v740_v26  ;;  %v955_v25 = vld [vmem:[%s2430_s10 + $0x48] sm:$0xff]  ;;  %v954_v26 = vld [vmem:[%s2430_s10 + $0x40] sm:$0xff] }
 0x12c   : > { %1584 = vmatmul.msk.f32.vlgmr.msra.gmra.mxu1 %vm748_vm4, %v744_v27  ;;  %988 = vmatpush.msrb.mxu3 %v955_v25 }
 0x12e   : > { %989 = vmatpush.msrb.mxu3 %v954_v26  ;;  %v2247_v26 = vld [vmem:[%s2433_s13] ss:$0 sm:$0xff] }
 0x135   : > { %v943_v5 = vpop.f32.mrf.mxu0 }
 0x136   : > { %v2126_v6 = vadd.f32 %v1687_v3, %v943_v5 }
 0x138   : > { %v964_v7 = vrot.slane %v2126_v6, 7  ;;  %v960_v56 = vrot.slane %v2126_v6, 6 }
 0x13a   : > { %v966_v8 = vsel %vm729_vm2, 0.0, %v964_v7  ;;  %v963_v58 = vsel %vm962_vm13, 0.0, %v960_v56  ;;  %v1620_v56 = vld [vmem:[%s2430_s10 + $0xb0] sm:$0xff] }
 0x13b   : > { %968 = vrot.lane.b32.xlu0 %v966_v8, %s2493_s26 }
 0x1a9   : > { %v769_v29 = vpop.f32.mrf.mxu1 }
 0x1aa   : > { %v770_v30 = vadd.f32 %v1686_v28, %v769_v29  ;;  %v953_v29 = vld [vmem:[%s2430_s10 + $0x38] sm:$0xff] }
 0x1ab   : > { %990 = vmatpush.msrb.mxu3 %v953_v29 }
 0x1ac   : > { %v1585_v31 = vmul.f32 -1.442695, %v770_v30 }
 0x1ad   : > { %v969_v59 = vpop.permute.xlu0 %968 }
 0x1ae   : > { %1696 = vpow2.f32 %v1585_v31  ;;  %v974_v60 = vsel %vm689_vm0, %v963_v58, %v969_v59  ;;  %v2278_v58 = vld [vmem:[%s2435_s15] ss:$0 sm:$0xff]  ;;  %v1616_v59 = vld [vmem:[%s2430_s10 + $0x90] sm:$0xff] }
 0x1b4   : > { %v1697_v32 = vpop.eup %1696 }
 0x1b5   : > { %v775_v33 = vadd.f32 1.0, %v1697_v32 }
 0x1b7   : > { %1698 = vrcp.f32 %v775_v33  ;;  %v787_v37 = vand.u32 2147483648, %v775_v33  ;;  %v785_v39 = vand.u32 2147483647, %v775_v33  ;;  %vm781_vm6 = vweird.f32 %v775_v33 }
 0x1b9   : > { %v788_v41 = vor.u32 1.1754944e-38, %v787_v37  ;;  %vm786_vm8 = vcmp.eq.f32.partialorder %v785_v39, 8.507059e+37 }
 0x1bd   : > { %v1699_v34 = vpop.eup %1698 }
 0x1be   : > { %v777_v35 = vmul.f32 %v1699_v34, %v775_v33  ;;  %vm782_vm5 = vweird.f32 %v1699_v34 }
 0x1bf   : > { %vm783_vm7 = vmor %vm781_vm6, %vm782_vm5  ;;  %vm1085_vm6 = vcmask 64512  }
 0x1c0   : > { %v778_v36 = vsub.f32 1.0, %v777_v35 }
 0x1c2   : > { %v779_v38 = vmul.f32 %v1699_v34, %v778_v36 }
 0x1c4   : > { %v780_v40 = vadd.f32 %v1699_v34, %v779_v38 }
 0x1c6   : > { %v784_v42 = vsel %vm783_vm7, %v1699_v34, %v780_v40  ;;  %v952_v40 = vld [vmem:[%s2430_s10 + $0x30] sm:$0xff] }
 0x1c7   : > { %v789_v43 = vsel %vm786_vm8, %v788_v41, %v784_v42  ;;  %991 = vmatpush.msrb.mxu3 %v952_v40  ;;  %v951_v41 = vld [vmem:[%s2430_s10 + $0x28] sm:$0xff]  ;;  %v950_v42 = vld [vmem:[%s2430_s10 + $0x20] sm:$0xff] }
 0x1c8   : > { %792 = vrot.lane.b32.xlu1 %v789_v43, %s2458_s27  ;;  %v949_v43 = vld [vmem:[%s2430_s10 + $0x18] sm:$0xff] }
 0x1c9   : > { %992 = vmatpush.msrb.mxu3 %v951_v41 }
 0x1cb   : > { %993 = vmatpush.msrb.mxu3 %v950_v42 }
 0x1cd   : > { %994 = vmatpush.msrb.mxu3 %v949_v43 }
 0x1cf   : > { %995 = vmatpush.msrb.mxu3 %v948_v44 }
 0x1d1   : > { %996 = vmatpush.msrb.mxu3 %v947_v45 }
 0x1d3   : > { %997 = vmatpush.msrb.mxu3 %v946_v46 }
 0x23a   : > { %v793_v49 = vpop.permute.xlu1 %792 }
 0x23b   : > { %v795_v50 = vmul.f32 %v793_v49, %v770_v30  ;;  %v2196_v49 = vld [vmem:[%s2434_s14 + $0x18] sm:$0xff] }
 0x23c   : > { %1156 = vmatpush.msrb.mxu2 %v2196_v49 }
 0x23d   : > { %v796_v51 = vadd.f32 %v795_v50, %v2027_v14  ;;  %v1028_v50 = vld [vmem:[%s2432_s12 + $0x10] sm:$0xff] }
 0x23e   : > { %1050 = vmatpush.msra.mxu0 %v1028_v50 }
 0x23f   : > { %v2080_v52 = vmul.f32 0.70710677, %v796_v51  ;;  %v2205_v51 = vld [vmem:[%s2434_s14 + $0x10] sm:$0xff] }
 0x240   : > { %1157 = vmatpush.msrb.mxu2 %v2205_v51 }
 0x241   : > { %820 = vrot.lane.b32.xlu1 %v2080_v52, %s2493_s26  ;;  %v817_v53 = vrot.slane %v2080_v52, 1  ;;  %v814_v9 = vrot.slane %v2080_v52, 7 }
 0x242   : > { %1158 = vmatpush.msrb.mxu2 %v2221_v63 }
 0x243   : > { %v819_v54 = vsel %vm733_vm1, %v817_v53, 0.0  ;;  %v816_v11 = vsel %vm729_vm2, 0.0, %v814_v9  ;;  %v1690_v9 = vld [vmem:[%s2431_s11] ss:$0 sm:$0xff] }
 0x244   : > { %824 = vrot.lane.b32.xlu2 %v819_v54, %s2494_s29  ;;  %1159 = vmatpush.msrb.mxu2 %v2230_v1 }
 0x249   : > { %971 = vrot.lane.b32.xlu1 %v2126_v6, %s2494_s29 }
 0x29e   : > { %v825_v12 = vpop.permute.xlu2 %824 }
 0x2b3   : > { %v821_v10 = vpop.permute.xlu1 %820 }
 0x2b4   : > { %v827_v13 = vsel %vm689_vm0, %v816_v11, %v821_v10 }
 0x2b5   : > { %v828_v14 = vsel %vm743_vm3, %v827_v13, %v825_v12 }
 0x2b6   : > { %1599 = vmatmul.msk.f32.vlgmr.msra.gmra.mxu2 %vm748_vm4, %v828_v14 }
 0x2bb   : > { %v972_v61 = vpop.permute.xlu1 %971 }
 0x2bc   : > { %v975_v62 = vsel %vm743_vm3, %v974_v60, %v972_v61  ;;  %v1615_v61 = vld [vmem:[%s2430_s10 + $0x88] sm:$0xff] }
 0x339   : > { %v852_v18 = vpop.f32.mrf.mxu2 }
 0x33a   : > { %v853_v19 = vadd.f32 %v1688_v15, %v852_v18 }
 0x33c   : > { %v1600_v21 = vmul.f32 -1.442695, %v853_v19 }
 0x33e   : > { %1700 = vpow2.f32 %v1600_v21 }
 0x344   : > { %v1701_v27 = vpop.eup %1700 }
 0x345   : > { %v858_v28 = vadd.f32 1.0, %v1701_v27 }
 0x347   : > { %1702 = vrcp.f32 %v858_v28  ;;  %v870_v33 = vand.u32 2147483648, %v858_v28  ;;  %v868_v35 = vand.u32 2147483647, %v858_v28  ;;  %vm864_vm10 = vweird.f32 %v858_v28 }
 0x349   : > { %v871_v37 = vor.u32 1.1754944e-38, %v870_v33  ;;  %vm869_vm12 = vcmp.eq.f32.partialorder %v868_v35, 8.507059e+37 }
 0x34d   : > { %v1703_v30 = vpop.eup %1702 }
 0x34e   : > { %v860_v31 = vmul.f32 %v1703_v30, %v858_v28  ;;  %vm865_vm9 = vweird.f32 %v1703_v30 }
 0x34f   : > { %vm866_vm11 = vmor %vm864_vm10, %vm865_vm9 }
 0x350   : > { %v861_v32 = vsub.f32 1.0, %v860_v31 }
 0x352   : > { %v862_v34 = vmul.f32 %v1703_v30, %v861_v32 }
 0x354   : > { %v863_v36 = vadd.f32 %v1703_v30, %v862_v34 }
 0x356   : > { %v867_v38 = vsel %vm866_vm11, %v1703_v30, %v863_v36 }
 0x357   : > { %v872_v39 = vsel %vm869_vm12, %v871_v37, %v867_v38 }
 0x358   : > { %875 = vrot.lane.b32.xlu2 %v872_v39, %s2497_s28 }
 0x3b2   : > { %v876_v53 = vpop.permute.xlu2 %875 }
 0x3b3   : > { %v878_v54 = vmul.f32 %v876_v53, %v853_v19 }
 0x3b5   : > { %v879_v55 = vadd.f32 %v878_v54, %v2080_v52  ;;  %v1027_v52 = vld [vmem:[%s2432_s12 + $0x8] sm:$0xff] }
 0x3b6   : > { %1051 = vmatpush.msra.mxu0 %v1027_v52 }
 0x3b7   : > { %v880_v57 = vmul.f32 0.70710677, %v879_v55  ;;  %v1621_v55 = vld [vmem:[%s2430_s10 + $0xb8] sm:$0xff] }
 0x3b8   : > { %1052 = vmatpush.msra.mxu0 %v1026_v0 }
 0x3b9   : > { %1601 = vmatmul.msk.f32.vlgmr.msra.gmra.mxu3 %vm689_vm0, %v880_v57  ;;  %v1617_v57 = vld [vmem:[%s2430_s10 + $0x98] sm:$0xff] }
 0x3c1   : > { %1603 = vmatmul.msk.f32.vlgmr.msrb.gmra.mxu3 %vm748_vm4, %v975_v62 }
 0x43c   : > { %v909_v3 = vpop.f32.mrf.mxu3 }
 0x43d   : > { %v910_v5 = vadd.f32 %v1689_v2, %v909_v3 }
 0x43f   : > { %1606 = vmatpush.xpose.msk.msrb.mxu0 %vm689_vm0, %v910_v5  ;;  %1626 = vmatpush.xpose.msk.msra.mxu2 %vm689_vm0, %v910_v5  ;;  %v912_v7 = vadd.f32 %v910_v5, %v1999_v4  ;;  %v1614_v5 = vld [vmem:[%s2430_s10 + $0x80] sm:$0xff] }
 0x441   : > { %v913_v8 = vmul.f32 0.70710677, %v912_v7  ;;  %v1612_v7 = vld [vmem:[%s2430_s10 + $0x70] sm:$0xff] }
 0x443   : > { %1128 = vmatpush.msrb.mxu1 %v913_v8  ;;  %1339 = vmatpush.msra.mxu3 %v913_v8  ;;  %v1611_v8 = vld [vmem:[%s2430_s10 + $0x68] sm:$0xff] }
 0x444   : > { %v999_v10 = vpop.f32.mrf.mxu3 }
 0x445   : > { %1264 = vmatpush.msra.mxu1 %v1029_v47  ;;  %v1000_v11 = vadd.f32 %v1690_v9, %v999_v10  ;;  %v1610_v9 = vld [vmem:[%s2430_s10 + $0x60] sm:$0xff] }
 0x447   : > { %1265 = vmatpush.msra.mxu1 %v1028_v50  ;;  %v1604_v12 = vmul.f32 -1.442695, %v1000_v11 }
 0x449   : > { %1266 = vmatpush.msra.mxu1 %v1027_v52  ;;  %1704 = vpow2.f32 %v1604_v12 }
 0x44b   : > { %1267 = vmatpush.msra.mxu1 %v1026_v0 }
 0x44f   : > { %v1705_v13 = vpop.eup %1704 }
 0x450   : > { %v1005_v14 = vadd.f32 1.0, %v1705_v13 }
 0x452   : > { %1706 = vrcp.f32 %v1005_v14  ;;  %v1017_v17 = vand.u32 2147483648, %v1005_v14  ;;  %v1015_v19 = vand.u32 2147483647, %v1005_v14  ;;  %vm1011_vm15 = vweird.f32 %v1005_v14 }
 0x454   : > { %v1018_v21 = vor.u32 1.1754944e-38, %v1017_v17  ;;  %vm1016_vm5 = vcmp.eq.f32.partialorder %v1015_v19, 8.507059e+37 }
 0x458   : > { %v1707_v15 = vpop.eup %1706 }
 0x459   : > { %v1007_v4 = vmul.f32 %v1707_v15, %v1005_v14  ;;  %vm1012_vm14 = vweird.f32 %v1707_v15 }
 0x45a   : > { %vm1013_vm1 = vmor %vm1011_vm15, %vm1012_vm14 }
 0x45b   : > { %v1008_v16 = vsub.f32 1.0, %v1007_v4  ;;  %v1693_v4 = vld [vmem:[%s2431_s11 + $0x1] ss:$0 sm:$0xff] }
 0x45d   : > { %v1009_v18 = vmul.f32 %v1707_v15, %v1008_v16 }
 0x45f   : > { %v1010_v20 = vadd.f32 %v1707_v15, %v1009_v18 }
 0x461   : > { %v1014_v22 = vsel %vm1013_vm1, %v1707_v15, %v1010_v20 }
 0x462   : > { %v1019_v23 = vsel %vm1016_vm5, %v1018_v21, %v1014_v22 }
 0x463   : > { %1022 = vrot.lane.b32.xlu2 %v1019_v23, %s2497_s28 }
 0x4bd   : > { %v1023_v24 = vpop.permute.xlu2 %1022 }
 0x4be   : > { %v1025_v25 = vmul.f32 %v1023_v24, %v1000_v11 }
 0x4c0   : > { %1605 = vmatmul.msk.f32.vlgmr.msra.gmra.mxu0 %vm689_vm0, %v1025_v25 }
 0x4c1   : > { %1209 = vmatpush.msra.mxu0 %v1621_v55 }
 0x4c3   : > { %1210 = vmatpush.msra.mxu0 %v1620_v56 }
 0x53d   : > { %v1054_v27 = vpop.f32.mrf.mxu0 }
 0x53e   : > { %v1055_v28 = vadd.f32 %v2247_v26, %v1054_v27 }
 0x540   : > { %v1057_v29 = vadd.f32 %v1055_v28, %v2075_v48 }
 0x542   : > { %v1058_v30 = vmul.f32 0.70710677, %v1057_v29 }
 0x544   : > { %1607 = vmatmul.msk.f32.vlgmr.msrb.gmra.mxu0 %vm689_vm0, %v1058_v30 }
 0x5c1   : > { %v1082_v31 = vpop.f32.mrf.mxu0 }
 0x5c2   : > { %v1086_v32 = vsel %vm1085_vm6, %v1082_v31, -inf }
 0x5c3   : > { %1087 = vmax.xlane.f32.xlu0 %v1086_v32 }
 0x636   : > { %v1088_v33 = vpop.xlane.xlu0 %1087 }
 0x637   : > { %v1089_v34 = vsub.f32 %v1082_v31, %v1088_v33 }
 0x639   : > { %v1090_v35 = vmul.f32 1.442695, %v1089_v34 }
 0x63b   : > { %1708 = vpow2.f32 %v1090_v35 }
 0x641   : > { %v1709_v36 = vpop.eup %1708 }
 0x642   : > { %v1092_v37 = vsel %vm1085_vm6, %v1709_v36, 0.0 }
 0x643   : > { %1093 = vadd.xlane.f32.xlu1 %v1092_v37 }
 0x6b6   : > { %v1094_v38 = vpop.xlane.xlu1 %1093 }
 0x6b7   : > { %1710 = vrcp.f32 %v1094_v38  ;;  %v1106_v42 = vand.u32 2147483648, %v1094_v38  ;;  %v1104_v44 = vand.u32 2147483647, %v1094_v38  ;;  %vm1100_vm8 = vweird.f32 %v1094_v38 }
 0x6b9   : > { %v1107_v46 = vor.u32 1.1754944e-38, %v1106_v42  ;;  %vm1105_vm10 = vcmp.eq.f32.partialorder %v1104_v44, 8.507059e+37 }
 0x6bd   : > { %v1711_v39 = vpop.eup %1710 }
 0x6be   : > { %v1096_v40 = vmul.f32 %v1711_v39, %v1094_v38  ;;  %vm1101_vm7 = vweird.f32 %v1711_v39 }
 0x6bf   : > { %vm1102_vm9 = vmor %vm1100_vm8, %vm1101_vm7 }
 0x6c0   : > { %v1097_v41 = vsub.f32 1.0, %v1096_v40 }
 0x6c2   : > { %v1098_v43 = vmul.f32 %v1711_v39, %v1097_v41 }
 0x6c4   : > { %v1099_v45 = vadd.f32 %v1711_v39, %v1098_v43 }
 0x6c6   : > { %v1103_v47 = vsel %vm1102_vm9, %v1711_v39, %v1099_v45 }
 0x6c7   : > { %v1108_v50 = vsel %vm1105_vm10, %v1107_v46, %v1103_v47 }
 0x6c8   : > { %v1109_v53 = vmul.f32 %v1709_v36, %v1108_v50 }
 0x6ca   : > { %1608 = vmatmul.msk.f32.vlgmr.msrb.gmra.mxu1 %vm1085_vm6, %v1109_v53 }
 0x6cb   : > { %1359 = vmatpush.msrb.mxu1 %v2196_v49  ;;  %v1619_v49 = vld [vmem:[%s2430_s10 + $0xa8] sm:$0xff] }
 0x6cc   : > { %1211 = vmatpush.msra.mxu0 %v1619_v49 }
 0x6cd   : > { %1360 = vmatpush.msrb.mxu1 %v2205_v51  ;;  %v1618_v51 = vld [vmem:[%s2430_s10 + $0xa0] sm:$0xff] }
 0x6ce   : > { %1212 = vmatpush.msra.mxu0 %v1618_v51 }
 0x6cf   : > { %1361 = vmatpush.msrb.mxu1 %v2221_v63 }
 0x6d0   : > { %1213 = vmatpush.msra.mxu0 %v1617_v57 }
 0x6d1   : > { %1362 = vmatpush.msrb.mxu1 %v2230_v1 }
 0x6d2   : > { %1214 = vmatpush.msra.mxu0 %v1616_v59 }
 0x6d4   : > { %1215 = vmatpush.msra.mxu0 %v1615_v61  ;;  %v1373_v61 = vld [vmem:[%s2436_s16 + $0x10] sm:$0xff] }
 0x6d6   : > { %1216 = vmatpush.msra.mxu0 %v1614_v5 }
 0x747   : > { %v1130_v54 = vpop.f32.mrf.mxu1 }
 0x748   : > { %1609 = vmatmul.msk.f32.vlgmr.msrb.gmra.mxu2 %vm689_vm0, %v1130_v54 }
 0x7cb   : > { %v1161_v60 = vpop.f32.mrf.mxu2 }
 0x7cc   : > { %v1162_v62 = vadd.f32 %v2278_v58, %v1161_v60  ;;  %v1374_v60 = vld [vmem:[%s2436_s16 + $0x18] sm:$0xff] }
 0x7cd   : > { %1394 = vmatpush.msrb.mxu2 %v1374_v60 }
 0x7ce   : > { %v1164_v52 = vadd.f32 %v1162_v62, %v1025_v25  ;;  %v1372_v62 = vld [vmem:[%s2436_s16 + $0x8] sm:$0xff] }
 0x7cf   : > { %1395 = vmatpush.msrb.mxu2 %v1373_v61 }
 0x7d0   : > { %v1165_v63 = vmul.f32 0.70710677, %v1164_v52  ;;  %v1371_v52 = vld [vmem:[%s2436_s16] sm:$0xff] }
 0x7d1   : > { %1396 = vmatpush.msrb.mxu2 %v1372_v62 }
 0x7d2   : > { %v1166_v0 = vadd.f32 %v1165_v63, %v2126_v6  ;;  %v1613_v6 = vld [vmem:[%s2430_s10 + $0x78] sm:$0xff] }
 0x7d3   : > { %1217 = vmatpush.msra.mxu0 %v1613_v6  ;;  %1397 = vmatpush.msrb.mxu2 %v1371_v52  ;;  %v1405_v63 = vld [vmem:[%s2438_s18 + $0x18] sm:$0xff] }
 0x7d4   : > { %v2288_v1 = vmul.f32 0.70710677, %v1166_v0  ;;  %v1404_v0 = vld [vmem:[%s2438_s18 + $0x10] sm:$0xff]  ;;  %1425 = vmatpush.msrb.mxu3 %v1405_v63 }
 0x7d5   : > { %1218 = vmatpush.msra.mxu0 %v1612_v7 }
 0x7d6   : > { %v1187_v2 = vrot.slane %v2288_v1, 7  ;;  %v1184_v11 = vrot.slane %v2288_v1, 6  ;;  %1426 = vmatpush.msrb.mxu3 %v1404_v0 }
 0x7d7   : > { %1219 = vmatpush.msra.mxu0 %v1611_v8 }
 0x7d8   : > { %v1189_v3 = vsel %vm729_vm2, 0.0, %v1187_v2  ;;  %v1186_v12 = vsel %vm962_vm13, 0.0, %v1184_v11  ;;  %v1403_v2 = vld [vmem:[%s2438_s18 + $0x8] sm:$0xff]  ;;  %v1694_v11 = vld [vmem:[%s2437_s17] ss:$0 sm:$0xff] }
 0x7d9   : > { %1191 = vrot.lane.b32.xlu2 %v1189_v3, %s2493_s26  ;;  %1220 = vmatpush.msra.mxu0 %v1610_v9 }
 0x7da   : > { %1427 = vmatpush.msrb.mxu3 %v1403_v2 }
 0x7e1   : > { %1194 = vrot.lane.b32.xlu2 %v2288_v1, %s2494_s29  ;;  %s1634_s29 = sshll.u32 %s1950_s3, 3  ;;  %s1740_s3 = scalar_lea.hbm %s2500_s23, 16 }
 0x7e2   : > { %s1466_s1 = scalar_lea.hbm %s2500_s23, %s1634_s29 }
 0x833   : > { %v1192_v10 = vpop.permute.xlu2 %1191 }
 0x834   : > { %v1197_v13 = vsel %vm689_vm0, %v1186_v12, %v1192_v10  ;;  %v1402_v10 = vld [vmem:[%s2438_s18] sm:$0xff] }
 0x835   : > { %1428 = vmatpush.msrb.mxu3 %v1402_v10 }
 0x83b   : > { %v1195_v14 = vpop.permute.xlu2 %1194 }
 0x83c   : > { %v1198_v15 = vsel %vm743_vm3, %v1197_v13, %v1195_v14 }
 0x83d   : > { %1623 = vmatmul.msk.f32.vlgmr.msra.gmra.mxu0 %vm748_vm4, %v1198_v15 }
 0x8ba   : > { %v1222_v16 = vpop.f32.mrf.mxu0 }
 0x8bb   : > { %v1223_v17 = vadd.f32 %v1693_v4, %v1222_v16 }
 0x8bd   : > { %v1624_v18 = vmul.f32 -1.442695, %v1223_v17 }
 0x8bf   : > { %1712 = vpow2.f32 %v1624_v18 }
 0x8c5   : > { %v1713_v19 = vpop.eup %1712 }
 0x8c6   : > { %v1228_v20 = vadd.f32 1.0, %v1713_v19 }
 0x8c8   : > { %1714 = vrcp.f32 %v1228_v20  ;;  %v1240_v24 = vand.u32 2147483648, %v1228_v20  ;;  %v1238_v27 = vand.u32 2147483647, %v1228_v20  ;;  %vm1234_vm3 = vweird.f32 %v1228_v20 }
 0x8ca   : > { %v1241_v29 = vor.u32 1.1754944e-38, %v1240_v24  ;;  %vm1239_vm11 = vcmp.eq.f32.partialorder %v1238_v27, 8.507059e+37 }
 0x8ce   : > { %v1715_v21 = vpop.eup %1714 }
 0x8cf   : > { %v1230_v22 = vmul.f32 %v1715_v21, %v1228_v20  ;;  %vm1235_vm2 = vweird.f32 %v1715_v21 }
 0x8d0   : > { %vm1236_vm4 = vmor %vm1234_vm3, %vm1235_vm2 }
 0x8d1   : > { %v1231_v23 = vsub.f32 1.0, %v1230_v22 }
 0x8d3   : > { %v1232_v25 = vmul.f32 %v1715_v21, %v1231_v23 }
 0x8d5   : > { %v1233_v28 = vadd.f32 %v1715_v21, %v1232_v25 }
 0x8d7   : > { %v1237_v30 = vsel %vm1236_vm4, %v1715_v21, %v1233_v28 }
 0x8d8   : > { %v1242_v31 = vsel %vm1239_vm11, %v1241_v29, %v1237_v30 }
 0x8d9   : > { %1245 = vrot.lane.b32.xlu2 %v1242_v31, %s2497_s28  ;;  %s2326_s28 = sand.u32 1, %s1806_s25  }
 0x8da   : > { %s2462_s4 = sshll.u32 %s2326_s28, 3  ;;  %s1442_s21 = scalar_lea.sflag [#allocation5], %s2326_s28 }
 0x8db   : > { %s2333_s24 = scalar_lea.vmem [#allocation4], %s2462_s4  ;;  %s1470_s4 = sshll.u32 %s1466_s1, 4  ;;  %s1471_s4 = int_to_ptr.hbm [resolvable:$true] %s1470_s4 }
 0x8dc   : > { %s1468_s0 = sshll.u32 %s2333_s24, 4  ;;  %s1734_s5 = sshra.s32 %s1471_s4, 4  ;;  %s1469_s0 = int_to_ptr.vmem [resolvable:$true] %s1468_s0  ;;  %s1735_s5 = int_to_ptr.hbm [resolvable:$true] %s1734_s5 }
 0x8dd   : > { %s1736_s6 = scalar_lea.hbm %s1735_s5, 8  ;;  %p1741_p0 = scmp.lt.s32.totalorder %s1735_s5, %s2500_s23 }
 0x8de   : > { %p1737_p11 = scmp.ne.s32.totalorder %s1735_s5, %s1736_s6  ;;  %p1742_p1 = scmp.lt.s32.totalorder %s1740_s3, %s1736_s6 }
 0x8e0   : > { %p1738_p12 = pnand %p1737_p11, %p1967_p5  ;;  %p1743_p2 = por %p1742_p1, %p1741_p0 }
 0x8e2   : > { %p1739_p13 = pneg %p1738_p12 }
 0x8e4   : > { %p1744_p3 = pnand %p1743_p2, %p1739_p13 }
 0x933   : > { %v1246_v32 = vpop.permute.xlu2 %1245 }
 0x934   : > { %v1248_v33 = vmul.f32 %v1246_v32, %v1223_v17 }
 0x936   : > { %1625 = vmatmul.msk.f32.vlgmr.msra.gmra.mxu1 %vm689_vm0, %v1248_v33 }
 0x9b3   : > { %v1269_v34 = vpop.f32.mrf.mxu1 }
 0x9b4   : > { %v1270_v35 = vadd.f32 %v2247_v26, %v1269_v34 }
 0x9b6   : > { %v1272_v36 = vadd.f32 %v1270_v35, %v2075_v48 }
 0x9b8   : > { %v1273_v37 = vmul.f32 0.70710677, %v1272_v36 }
 0x9ba   : > { %1627 = vmatmul.msk.f32.vlgmr.msra.gmra.mxu2 %vm689_vm0, %v1273_v37 }
 0xa3d   : > { %v1294_v38 = vpop.f32.mrf.mxu2 }
 0xa3e   : > { %v1297_v39 = vsel %vm1085_vm6, %v1294_v38, -inf }
 0xa3f   : > { %1298 = vmax.xlane.f32.xlu2 %v1297_v39 }
 0xab2   : > { %v1299_v40 = vpop.xlane.xlu2 %1298 }
 0xab3   : > { %v1300_v41 = vsub.f32 %v1294_v38, %v1299_v40 }
 0xab5   : > { %v1301_v42 = vmul.f32 1.442695, %v1300_v41 }
 0xab7   : > { %1716 = vpow2.f32 %v1301_v42 }
 0xabd   : > { %v1717_v43 = vpop.eup %1716 }
 0xabe   : > { %v1303_v44 = vsel %vm1085_vm6, %v1717_v43, 0.0 }
 0xabf   : > { %1304 = vadd.xlane.f32.xlu0 %v1303_v44 }
 0xb32   : > { %v1305_v45 = vpop.xlane.xlu0 %1304 }
 0xb33   : > { %1718 = vrcp.f32 %v1305_v45  ;;  %v1317_v47 = vand.u32 2147483648, %v1305_v45  ;;  %v1315_v53 = vand.u32 2147483647, %v1305_v45  ;;  %vm1311_vm13 = vweird.f32 %v1305_v45 }
 0xb35   : > { %v1318_v55 = vor.u32 1.1754944e-38, %v1317_v47  ;;  %vm1316_vm15 = vcmp.eq.f32.partialorder %v1315_v53, 8.507059e+37 }
 0xb39   : > { %v1719_v26 = vpop.eup %1718 }
 0xb3a   : > { %v1307_v48 = vmul.f32 %v1719_v26, %v1305_v45  ;;  %vm1312_vm12 = vweird.f32 %v1719_v26 }
 0xb3b   : > { %vm1313_vm14 = vmor %vm1311_vm13, %vm1312_vm12 }
 0xb3c   : > { %v1308_v46 = vsub.f32 1.0, %v1307_v48 }
 0xb3e   : > { %v1309_v50 = vmul.f32 %v1719_v26, %v1308_v46 }
 0xb40   : > { %v1310_v54 = vadd.f32 %v1719_v26, %v1309_v50 }
 0xb42   : > { %v1314_v56 = vsel %vm1313_vm14, %v1719_v26, %v1310_v54 }
 0xb43   : > { %v1319_v49 = vsel %vm1316_vm15, %v1318_v55, %v1314_v56 }
 0xb44   : > { %v1320_v51 = vmul.f32 %v1717_v43, %v1319_v49 }
 0xb46   : > { %1628 = vmatmul.msk.f32.vlgmr.msra.gmra.mxu3 %vm1085_vm6, %v1320_v51  ;;  %v1434_v57 = vsel %vm1085_vm6, %v1320_v51, 0.0 }
 0xb47   : > { %1435 = vst [vmem:[%s2333_s24] sm:$0xff] %v1434_v57 }
 0xbc9   : > { %v1341_v59 = vpop.f32.mrf.mxu3 }
 0xbca   : > { %1629 = vmatmul.msk.f32.vlgmr.msrb.gmra.mxu1 %vm689_vm0, %v1341_v59 }
 0xc47   : > { %v1364_v3 = vpop.f32.mrf.mxu1 }
 0xc48   : > { %v1365_v5 = vadd.f32 %v2278_v58, %v1364_v3 }
 0xc4a   : > { %v1367_v6 = vadd.f32 %v1365_v5, %v1248_v33 }
 0xc4c   : > { %v1368_v7 = vmul.f32 0.70710677, %v1367_v6 }
 0xc4e   : > { %v1369_v8 = vadd.f32 %v1368_v7, %v2288_v1 }
 0xc50   : > { %v1370_v9 = vmul.f32 0.70710677, %v1369_v8 }
 0xc52   : > { %1630 = vmatmul.msk.f32.vlgmr.msrb.gmra.mxu2 %vm689_vm0, %v1370_v9 }
 0xcd5   : > { %v1399_v12 = vpop.f32.mrf.mxu2 }
 0xcd6   : > { %v1400_v58 = vadd.f32 %v1694_v11, %v1399_v12 }
 0xcd8   : > { %1631 = vmatmul.msk.f32.vlgmr.msrb.gmra.mxu3 %vm689_vm0, %v1400_v58 }
 0xcd9   : > { %1747 = shalt.err (!%p1744_p3)
}
 0xcda   : > { %1639 = dma.vmem_to_hbm [thread:$0]  (%p1967_p5), %s1469_s0, 128, %s1471_s4, %s1442_s21  }
 0xcdb   : > { %s2501_s20 = sld [smem:[#allocation26_spill]]  ;;  %s2503_s7 = sshll.u32 %s2326_s28, 3 }
 0xcdc   : > { %s2502_s9 = sld [smem:[#allocation25_spill]]  ;;  %s664_s8 = scalar_lea.vmem [#allocation2], %s2503_s7 }
 0xcdd   : > { %s1454_s6 = sshll.u32 %s664_s8, 4  ;;  %s1437_s3 = scalar_lea.sflag [#allocation3], %s2326_s28  ;;  %s1455_s6 = int_to_ptr.vmem [resolvable:$true] %s1454_s6 }
 0xce1   : > { %s1452_s1 = scalar_lea.hbm %s2501_s20, %s1634_s29 }
 0xce2   : > { %v1695_v1 = vld [vmem:[%s2502_s9] ss:$0 sm:$0xff]  ;;  %s1456_s5 = sshll.u32 %s1452_s1, 4  ;;  %s1768_s9 = scalar_lea.hbm %s2501_s20, 16  ;;  %s1457_s5 = int_to_ptr.hbm [resolvable:$true] %s1456_s5 }
 0xce3   : > { %s1762_s4 = sshra.s32 %s1457_s5, 4  ;;  %s1763_s4 = int_to_ptr.hbm [resolvable:$true] %s1762_s4 }
 0xce4   : > { %s1764_s0 = scalar_lea.hbm %s1763_s4, 8  ;;  %p1769_p9 = scmp.lt.s32.totalorder %s1763_s4, %s2501_s20 }
 0xce5   : > { %p1765_p4 = scmp.ne.s32.totalorder %s1763_s4, %s1764_s0  ;;  %p1770_p10 = scmp.lt.s32.totalorder %s1768_s9, %s1764_s0 }
 0xce7   : > { %p1766_p7 = pnand %p1765_p4, %p1967_p5  ;;  %p1771_p11 = por %p1770_p10, %p1769_p9 }
 0xce9   : > { %p1767_p8 = pneg %p1766_p7 }
 0xceb   : > { %p1772_p12 = pnand %p1771_p11, %p1767_p8 }
 0xd5b   : > { %v1430_v13 = vpop.f32.mrf.mxu3 }
 0xd5c   : > { %v1431_v14 = vadd.f32 %v1695_v1, %v1430_v13 }
 0xd5e   : > { %1433 = vst [vmem:[%s664_s8] sm:$0xff] %v1431_v14 }
 0xd5f   : > { %1775 = shalt.err (!%p1772_p12)
}
 0xd60   : > { %1638 = dma.vmem_to_hbm [thread:$0]  (%p1967_p5), %s1455_s6, 128, %s1457_s5, %s1437_s3  }
 0xd61 PF: > { %s2504_s28 = sld [smem:[#allocation10_spill]] }
 0xd62   : > { %s2505_s1 = sld [smem:[#allocation8_spill]] }
 0xd67   : > { %p1649_p13 = scmp.ge.s32.totalorder %s2504_s28, 2 }
 0xd68   : > { %s1482_s27 = sand.u32 1, %s2505_s1  }
 0xd69   : > { %p1643_p0 = pnand %p1649_p13, %p1971_p6  ;;  %s1483_s7 = scalar_lea.sflag [#allocation3], %s1482_s27 }
 0xd6b   : > { %p1644_p1 = pneg %p1643_p0 }
 0xd6d   : > { %1793 = dma.done.wait (%p1644_p1), %s1483_s7, 128  }
 0xd6e   : > { %1795 = vsyncadd (%p1644_p1), %s1483_s7, 4294967168  ;;  %s1493_s8 = scalar_lea.sflag [#allocation5], %s1482_s27 }
 0xd6f   : > { %1797 = dma.done.wait (%p1644_p1), %s1493_s8, 128  }
 0xd70   : > { %1799 = vsyncadd (%p1644_p1), %s1493_s8, 4294967168  ;;  %s2507_s27 = sld [smem:[#allocation11_spill]]  ;;  %s2510_s2 = smov %s1806_s25 }
 0xd71   : > { %s2508_s4 = sld [smem:[#allocation9_spill]] }
 0xd72   : > { %s2509_s26 = sld [smem:[#allocation12_spill]] }
 0xd76   : > { %p35_p5 = scmp.ge.s32.totalorder %s2507_s27, 4  }
 0xd77   : > { %s2511_s25 = smov %s2508_s4 }
 0xd78   :  { %37 = sbr.rel (!%p35_p5) target bundleno = 19 (0x13), region = 159 }
 0xd7d   :  { %1499 = vsyncpa [#allocation3], 1 }
 0xd7e   :  { %1501 = vsyncpa [#allocation3 + $0x1], 1 }
 0xd7f   :  { %1502 = vsyncpa [#allocation5], 1 }
 0xd80   :  { %1504 = vsyncpa [#allocation5 + $0x1], 1 }

</bundles_post_ra>
